<compile_context>
chip_gen: v5e
topology: v5e:2x2
jax: 0.10.0
libtpu: 0.0.40
codegen_flags: <defaults>
</compile_context>

<pallas_src>
import jax
import jax.numpy as jnp
from jax.experimental import pallas as pl
from jax.experimental.pallas import tpu as pltpu

LANES = 128  # lane-dense classifier output width (wrapper slices :num_classes)


def _choose_clips_per_block(n, t, max_rows):
    """Pick clips-per-block for the grid.

    Must divide N; both the frame-row block (cpb*T) and the per-clip output
    block (cpb) must be sublane-tile friendly (multiples of 8) unless the
    block spans the whole array.  Among valid choices take the biggest block
    that stays under `max_rows` rows.
    """
    candidates = [
        c for c in range(1, n + 1)
        if n % c == 0 and (c == n or (c % 8 == 0 and (c * t) % 8 == 0))
    ]
    within = [c for c in candidates if c * t <= max_rows]
    return max(within) if within else min(candidates)


# ---------------------------------------------------------------------------
# Pallas wrapper: temporal head, pipelined over clip blocks.
# ---------------------------------------------------------------------------
def temporal_head(x_features, params, im_per_sample, num_classes,
                  *, max_rows_per_block=512):
    """x_features: (B, C_IN) f32 per-frame features (forward_features output).

    Returns (N, num_classes) logits, N = B // im_per_sample.
    """
    b, c_in = x_features.shape
    assert b % im_per_sample == 0, "Batch size is not a multiple of sequence length."
    t = im_per_sample
    n = b // t

    cpb = _choose_clips_per_block(n, t, max_rows_per_block)  # clips per block
    rows = cpb * t                                           # frame rows per block
    grid = (n // cpb,)

    def kernel(x_ref,
               w0_ref, s0_ref, b0_ref,
               w1_ref, s1_ref, b1_ref,
               w2_ref, s2_ref, b2_ref,
               w3_ref, s3_ref, b3_ref,
               wc_ref, bc_ref, out_ref):
        # Row masks: first / last frame of each clip inside this block
        # (prevents cross-clip leakage when the flattened block is shifted).
        row = jax.lax.broadcasted_iota(jnp.int32, (rows, 1), 0)
        tt = row % t
        is_first = tt == 0
        is_last = tt == (t - 1)

        def conv_bn_relu(h, w_ref, s_ref, b_ref):
            # h: (rows, Cin) f32.  Conv1d k=3, stride=1, zero 'same' padding.
            # Temporal shifts via XLU sublane roll; the wrapped rows are
            # exactly the masked clip-boundary rows.
            h_m1 = jnp.where(is_first, 0.0, pltpu.roll(h, shift=1, axis=0))
            h_p1 = jnp.where(is_last, 0.0, pltpu.roll(h, shift=rows - 1, axis=0))
            # Three accumulated tap matmuls (no lane-axis concat of 32/64-wide
            # slabs).  bf16 operands, f32 accumulation on the MXU.
            y = (jnp.dot(h_m1.astype(jnp.bfloat16), w_ref[0],
                         preferred_element_type=jnp.float32)
                 + jnp.dot(h.astype(jnp.bfloat16), w_ref[1],
                           preferred_element_type=jnp.float32)
                 + jnp.dot(h_p1.astype(jnp.bfloat16), w_ref[2],
                           preferred_element_type=jnp.float32))
            # Conv bias + eval-mode BatchNorm1d folded into scale/bias.
            y = y * s_ref[...] + b_ref[...]
            return jnp.maximum(y, 0.0)                       # ReLU

        h = conv_bn_relu(x_ref[...], w0_ref, s0_ref, b0_ref)  # forward_stage1
        h = conv_bn_relu(h, w1_ref, s1_ref, b1_ref)
        h = conv_bn_relu(h, w2_ref, s2_ref, b2_ref)           # forward_stage2
        h = conv_bn_relu(h, w3_ref, s3_ref, b3_ref)

        # forward_classifier: temporal mean per clip as a tile-aligned
        # sublane reduction (replaces the block-diagonal pool matmul).
        pooled = h.reshape(cpb, t, h.shape[-1]).sum(axis=1) * (1.0 / t)
        logits = jnp.dot(pooled.astype(jnp.bfloat16), wc_ref[...],
                         preferred_element_type=jnp.float32) + bc_ref[...]
        out_ref[...] = logits                                 # (cpb, 128) lane-dense

    weights = [
        params["w0"], params["s0"], params["b0"],
        params["w1"], params["s1"], params["b1"],
        params["w2"], params["s2"], params["b2"],
        params["w3"], params["s3"], params["b3"],
        params["wc"], params["bc"],
    ]

    def _resident_spec(a):
        nd = a.ndim
        return pl.BlockSpec(a.shape, lambda i, _nd=nd: (0,) * _nd)  # same block every step

    in_specs = ([pl.BlockSpec((rows, c_in), lambda i: (i, 0))]       # frame features
                + [_resident_spec(a) for a in weights])
    out_specs = pl.BlockSpec((cpb, LANES), lambda i: (i, 0))

    out = pl.pallas_call(
        kernel,
        grid=grid,
        out_shape=jax.ShapeDtypeStruct((n, LANES), jnp.float32),
        in_specs=in_specs,
        out_specs=out_specs,
        compiler_params=pltpu.CompilerParams(
            dimension_semantics=("parallel",),        # shard clip blocks across TCs
            vmem_limit_bytes=32 * 1024 * 1024,        # fits v7x (64 MiB phys) w/ headroom
        ),
    )(x_features, *weights)
    return out[:, :num_classes]


# ---------------------------------------------------------------------------
# Deterministic parameter construction (synthetic weights, no checkpoint).
# All constant prep (dtype casts, lane-dense classifier padding) happens HERE,
# once, not per call.
# ---------------------------------------------------------------------------
def make_conv_bn_params(key, cin, cout, eps=1e-5):
    k1, k2, k3, k4, k5, k6 = jax.random.split(key, 6)
    w = jax.random.normal(k1, (3, cin, cout), jnp.float32) / jnp.sqrt(3.0 * cin)
    conv_b = 0.05 * jax.random.normal(k2, (cout,), jnp.float32)
    gamma = 1.0 + 0.1 * jax.random.normal(k3, (cout,), jnp.float32)
    beta = 0.1 * jax.random.normal(k4, (cout,), jnp.float32)
    rmean = 0.1 * jax.random.normal(k5, (cout,), jnp.float32)
    rvar = 1.0 + 0.1 * jnp.abs(jax.random.normal(k6, (cout,), jnp.float32))
    scale = gamma / jnp.sqrt(rvar + eps)
    bias = (conv_b - rmean) * scale + beta
    # Taps kept separate: (3, Cin, Cout), MXU-native bf16.
    return w.astype(jnp.bfloat16), scale.reshape(1, cout), bias.reshape(1, cout)


def make_params(key, c_in, num_classes):
    ks = jax.random.split(key, 6)
    w0, s0, b0 = make_conv_bn_params(ks[0], c_in, 64)    # conv1d_0
    w1, s1, b1 = make_conv_bn_params(ks[1], 64, 64)      # conv1d_1
    w2, s2, b2 = make_conv_bn_params(ks[2], 64, 128)     # conv1d_2
    w3, s3, b3 = make_conv_bn_params(ks[3], 128, 128)    # conv1d_3
    wc = jax.random.normal(ks[4], (128, num_classes), jnp.float32) / jnp.sqrt(128.0)
    bc = 0.05 * jax.random.normal(ks[5], (1, num_classes), jnp.float32)
    # Lane-dense classifier: pad to 128 output lanes once, store wc in bf16.
    wc_pad = jnp.zeros((128, LANES), jnp.float32).at[:, :num_classes].set(wc)
    bc_pad = jnp.zeros((1, LANES), jnp.float32).at[:, :num_classes].set(bc)
    return dict(w0=w0, s0=s0, b0=b0, w1=w1, s1=s1, b1=b1,
                w2=w2, s2=s2, b2=b2, w3=w3, s3=s3, b3=b3,
                wc=wc_pad.astype(jnp.bfloat16), bc=bc_pad)


# ---------------------------------------------------------------------------
# Pure-JAX reference (mirrors forward_stage1/2/classifier with identical
# bf16-operand / f32-accumulate math).
# ---------------------------------------------------------------------------
def _conv1d_block_ref(x, w_bf16, scale, bias):
    # x: (N, T, C)
    xb = x.astype(jnp.bfloat16)
    z = jnp.zeros_like(xb[:, :1, :])
    x_m1 = jnp.concatenate([z, xb[:, :-1, :]], axis=1)    # x[t-1]
    x_p1 = jnp.concatenate([xb[:, 1:, :], z], axis=1)     # x[t+1]
    y = (jnp.einsum("ntk,ko->nto", x_m1, w_bf16[0], preferred_element_type=jnp.float32)
         + jnp.einsum("ntk,ko->nto", xb, w_bf16[1], preferred_element_type=jnp.float32)
         + jnp.einsum("ntk,ko->nto", x_p1, w_bf16[2], preferred_element_type=jnp.float32))
    return jnp.maximum(y * scale[None] + bias[None], 0.0)


def reference_head(x_features, p, im_per_sample, num_classes):
    b, c = x_features.shape
    n = b // im_per_sample
    x = x_features.reshape(n, im_per_sample, c)            # forward_stage1 view
    h = _conv1d_block_ref(x, p["w0"], p["s0"], p["b0"])
    h = _conv1d_block_ref(h, p["w1"], p["s1"], p["b1"])
    h = _conv1d_block_ref(h, p["w2"], p["s2"], p["b2"])
    h = _conv1d_block_ref(h, p["w3"], p["s3"], p["b3"])
    pooled = h.mean(axis=1)                                 # mean over time
    logits = jnp.einsum("nc,co->no", pooled.astype(jnp.bfloat16), p["wc"],
                        preferred_element_type=jnp.float32) + p["bc"]
    return logits[:, :num_classes]


# ---------------------------------------------------------------------------
if __name__ == "__main__":
    # Module config (small): stages_out_channels[-1] = 32 feature channels,
    # num_classes = 7, im_per_sample = 8 frames per clip, 32 clips.
    C_LAST = 32
    NUM_CLASSES = 7
    IM_PER_SAMPLE = 8
    N_SAMPLES = 32

    key = jax.random.PRNGKey(0)
    k_x, k_p = jax.random.split(key)

    # Per-frame features, i.e. the output of forward_features: (B, C_LAST).
    B = N_SAMPLES * IM_PER_SAMPLE
    x_features = jax.random.normal(k_x, (B, C_LAST), jnp.float32)

    params = make_params(k_p, C_LAST, NUM_CLASSES)

    # max_rows_per_block=64 forces a 4-step grid (8 clips / 64 frame rows per
    # block) even at this small demo size so the pipelined path is exercised;
    # production sizes should use the default (biggest block under 512 rows).
    out = temporal_head(x_features, params, IM_PER_SAMPLE, NUM_CLASSES,
                        max_rows_per_block=64)
    out = jax.block_until_ready(out)

    ref = reference_head(x_features, params, IM_PER_SAMPLE, NUM_CLASSES)
    assert out.shape == (N_SAMPLES, NUM_CLASSES)
    assert jnp.allclose(out, ref, rtol=1e-2, atol=1e-2), (out, ref)

    print("KERNEL_OK")
</pallas_src>

<mosaic_0001>
module attributes {stable_mosaic.version = 11 : i64} {
  func.func @kernel(%arg0: i32, %arg1: memref<64x32xf32, #tpu.memory_space<vmem>>, %arg2: memref<3x32x64xbf16, #tpu.memory_space<vmem>>, %arg3: memref<1x64xf32, #tpu.memory_space<vmem>>, %arg4: memref<1x64xf32, #tpu.memory_space<vmem>>, %arg5: memref<3x64x64xbf16, #tpu.memory_space<vmem>>, %arg6: memref<1x64xf32, #tpu.memory_space<vmem>>, %arg7: memref<1x64xf32, #tpu.memory_space<vmem>>, %arg8: memref<3x64x128xbf16, #tpu.memory_space<vmem>>, %arg9: memref<1x128xf32, #tpu.memory_space<vmem>>, %arg10: memref<1x128xf32, #tpu.memory_space<vmem>>, %arg11: memref<3x128x128xbf16, #tpu.memory_space<vmem>>, %arg12: memref<1x128xf32, #tpu.memory_space<vmem>>, %arg13: memref<1x128xf32, #tpu.memory_space<vmem>>, %arg14: memref<128x128xbf16, #tpu.memory_space<vmem>>, %arg15: memref<1x128xf32, #tpu.memory_space<vmem>>, %arg16: memref<8x128xf32, #tpu.memory_space<vmem>>) attributes {dimension_semantics = [#tpu.dimension_semantics<parallel>], iteration_bounds = array<i64: 4>, scalar_prefetch = 0 : i64, scratch_operands = 0 : i64, tpu.core_type = #tpu.core_type<tc>, window_params = [{transform_indices = @transform_0, window_bounds = array<i64: 64, 32>}, {pipeline_mode = #tpu.pipeline_mode<synchronous>, transform_indices = @transform_1, window_bounds = array<i64: 3, 32, 64>}, {pipeline_mode = #tpu.pipeline_mode<synchronous>, transform_indices = @transform_2, window_bounds = array<i64: 1, 64>}, {pipeline_mode = #tpu.pipeline_mode<synchronous>, transform_indices = @transform_3, window_bounds = array<i64: 1, 64>}, {pipeline_mode = #tpu.pipeline_mode<synchronous>, transform_indices = @transform_4, window_bounds = array<i64: 3, 64, 64>}, {pipeline_mode = #tpu.pipeline_mode<synchronous>, transform_indices = @transform_5, window_bounds = array<i64: 1, 64>}, {pipeline_mode = #tpu.pipeline_mode<synchronous>, transform_indices = @transform_6, window_bounds = array<i64: 1, 64>}, {pipeline_mode = #tpu.pipeline_mode<synchronous>, transform_indices = @transform_7, window_bounds = array<i64: 3, 64, 128>}, {pipeline_mode = #tpu.pipeline_mode<synchronous>, transform_indices = @transform_8, window_bounds = array<i64: 1, 128>}, {pipeline_mode = #tpu.pipeline_mode<synchronous>, transform_indices = @transform_9, window_bounds = array<i64: 1, 128>}, {pipeline_mode = #tpu.pipeline_mode<synchronous>, transform_indices = @transform_10, window_bounds = array<i64: 3, 128, 128>}, {pipeline_mode = #tpu.pipeline_mode<synchronous>, transform_indices = @transform_11, window_bounds = array<i64: 1, 128>}, {pipeline_mode = #tpu.pipeline_mode<synchronous>, transform_indices = @transform_12, window_bounds = array<i64: 1, 128>}, {pipeline_mode = #tpu.pipeline_mode<synchronous>, transform_indices = @transform_13, window_bounds = array<i64: 128, 128>}, {pipeline_mode = #tpu.pipeline_mode<synchronous>, transform_indices = @transform_14, window_bounds = array<i64: 1, 128>}, {transform_indices = @transform_15, window_bounds = array<i64: 8, 128>}]} {
    %0 = tpu.iota {dimensions = array<i32: 0>} : vector<64x1xi32>
    %c8_i32 = arith.constant 8 : i32
    %c0_i32 = arith.constant 0 : i32
    %1 = arith.cmpi eq, %c8_i32, %c0_i32 : i32
    %c1_i32 = arith.constant 1 : i32
    %2 = arith.select %1, %c1_i32, %c8_i32 : i32
    %3 = vector.broadcast %2 : i32 to vector<64x1xi32>
    %4 = arith.remsi %0, %3 : vector<64x1xi32>
    %c0_i32_0 = arith.constant 0 : i32
    %5 = vector.broadcast %c0_i32_0 : i32 to vector<64x1xi32>
    %6 = arith.cmpi ne, %4, %5 : vector<64x1xi32>
    %c0_i32_1 = arith.constant 0 : i32
    %7 = vector.broadcast %c0_i32_1 : i32 to vector<64x1xi32>
    %8 = arith.cmpi slt, %4, %7 : vector<64x1xi32>
    %c0_i32_2 = arith.constant 0 : i32
    %9 = arith.cmpi slt, %2, %c0_i32_2 : i32
    %10 = vector.broadcast %9 : i1 to vector<64x1xi1>
    %11 = vector.broadcast %10 : vector<64x1xi1> to vector<64x1xi1>
    %12 = arith.xori %8, %11 : vector<64x1xi1>
    %13 = arith.andi %12, %6 : vector<64x1xi1>
    %14 = vector.broadcast %2 : i32 to vector<64x1xi32>
    %15 = arith.addi %4, %14 : vector<64x1xi32>
    %16 = arith.select %13, %15, %4 : vector<64x1xi1>, vector<64x1xi32>
    %c0_i32_3 = arith.constant 0 : i32
    %17 = vector.broadcast %c0_i32_3 : i32 to vector<64x1xi32>
    %18 = arith.cmpi eq, %16, %17 : vector<64x1xi32>
    %c7_i32 = arith.constant 7 : i32
    %19 = vector.broadcast %c7_i32 : i32 to vector<64x1xi32>
    %20 = arith.cmpi eq, %16, %19 : vector<64x1xi32>
    %c0 = arith.constant 0 : index
    %c0_4 = arith.constant 0 : index
    %21 = vector.load %arg1[%c0, %c0_4] : memref<64x32xf32, #tpu.memory_space<vmem>>, vector<64x32xf32>
    %c1_i32_5 = arith.constant 1 : i32
    %22 = tpu.dynamic_rotate %21 by %c1_i32_5 dim 0 : vector<64x32xf32>, i32 -> vector<64x32xf32>
    %cst = arith.constant 0.000000e+00 : f32
    %23 = vector.shape_cast %18 : vector<64x1xi1> to vector<64x1xi1>
    %24 = vector.broadcast %23 : vector<64x1xi1> to vector<64x32xi1>
    %25 = vector.broadcast %cst : f32 to vector<64x32xf32>
    %26 = arith.select %24, %25, %22 : vector<64x32xi1>, vector<64x32xf32>
    %c63_i32 = arith.constant 63 : i32
    %27 = tpu.dynamic_rotate %21 by %c63_i32 dim 0 : vector<64x32xf32>, i32 -> vector<64x32xf32>
    %cst_6 = arith.constant 0.000000e+00 : f32
    %28 = vector.shape_cast %20 : vector<64x1xi1> to vector<64x1xi1>
    %29 = vector.broadcast %28 : vector<64x1xi1> to vector<64x32xi1>
    %30 = vector.broadcast %cst_6 : f32 to vector<64x32xf32>
    %31 = arith.select %29, %30, %27 : vector<64x32xi1>, vector<64x32xf32>
    %32 = arith.truncf %26 : vector<64x32xf32> to vector<64x32xbf16>
    %c0_7 = arith.constant 0 : index
    %c0_8 = arith.constant 0 : index
    %c0_9 = arith.constant 0 : index
    %33 = vector.load %arg2[%c0_7, %c0_8, %c0_9] : memref<3x32x64xbf16, #tpu.memory_space<vmem>>, vector<1x32x64xbf16>
    %34 = vector.shape_cast %33 : vector<1x32x64xbf16> to vector<32x64xbf16>
    %cst_10 = arith.constant dense<0.000000e+00> : vector<64x64xf32>
    %35 = tpu.matmul %32, %34, %cst_10 {dimension_numbers = #tpu.dot_dimension_numbers<[1], [0], [0], [1], [0, 0, 1, 1], [], []>} : vector<64x32xbf16>, vector<32x64xbf16>, vector<64x64xf32> -> vector<64x64xf32>
    %36 = arith.truncf %21 : vector<64x32xf32> to vector<64x32xbf16>
    %c1 = arith.constant 1 : index
    %c0_11 = arith.constant 0 : index
    %c0_12 = arith.constant 0 : index
    %37 = vector.load %arg2[%c1, %c0_11, %c0_12] : memref<3x32x64xbf16, #tpu.memory_space<vmem>>, vector<1x32x64xbf16>
    %38 = vector.shape_cast %37 : vector<1x32x64xbf16> to vector<32x64xbf16>
    %cst_13 = arith.constant dense<0.000000e+00> : vector<64x64xf32>
    %39 = tpu.matmul %36, %38, %cst_13 {dimension_numbers = #tpu.dot_dimension_numbers<[1], [0], [0], [1], [0, 0, 1, 1], [], []>} : vector<64x32xbf16>, vector<32x64xbf16>, vector<64x64xf32> -> vector<64x64xf32>
    %40 = arith.addf %35, %39 : vector<64x64xf32>
    %41 = arith.truncf %31 : vector<64x32xf32> to vector<64x32xbf16>
    %c2 = arith.constant 2 : index
    %c0_14 = arith.constant 0 : index
    %c0_15 = arith.constant 0 : index
    %42 = vector.load %arg2[%c2, %c0_14, %c0_15] : memref<3x32x64xbf16, #tpu.memory_space<vmem>>, vector<1x32x64xbf16>
    %43 = vector.shape_cast %42 : vector<1x32x64xbf16> to vector<32x64xbf16>
    %cst_16 = arith.constant dense<0.000000e+00> : vector<64x64xf32>
    %44 = tpu.matmul %41, %43, %cst_16 {dimension_numbers = #tpu.dot_dimension_numbers<[1], [0], [0], [1], [0, 0, 1, 1], [], []>} : vector<64x32xbf16>, vector<32x64xbf16>, vector<64x64xf32> -> vector<64x64xf32>
    %45 = arith.addf %40, %44 : vector<64x64xf32>
    %c0_17 = arith.constant 0 : index
    %c0_18 = arith.constant 0 : index
    %46 = vector.load %arg3[%c0_17, %c0_18] : memref<1x64xf32, #tpu.memory_space<vmem>>, vector<1x64xf32>
    %47 = vector.broadcast %46 : vector<1x64xf32> to vector<64x64xf32>
    %48 = arith.mulf %45, %47 : vector<64x64xf32>
    %c0_19 = arith.constant 0 : index
    %c0_20 = arith.constant 0 : index
    %49 = vector.load %arg4[%c0_19, %c0_20] : memref<1x64xf32, #tpu.memory_space<vmem>>, vector<1x64xf32>
    %50 = vector.broadcast %49 : vector<1x64xf32> to vector<64x64xf32>
    %51 = arith.addf %48, %50 : vector<64x64xf32>
    %cst_21 = arith.constant 0.000000e+00 : f32
    %52 = vector.broadcast %cst_21 : f32 to vector<64x64xf32>
    %53 = arith.maximumf %51, %52 : vector<64x64xf32>
    %c1_i32_22 = arith.constant 1 : i32
    %54 = tpu.dynamic_rotate %53 by %c1_i32_22 dim 0 : vector<64x64xf32>, i32 -> vector<64x64xf32>
    %cst_23 = arith.constant 0.000000e+00 : f32
    %55 = vector.shape_cast %18 : vector<64x1xi1> to vector<64x1xi1>
    %56 = vector.broadcast %55 : vector<64x1xi1> to vector<64x64xi1>
    %57 = vector.broadcast %cst_23 : f32 to vector<64x64xf32>
    %58 = arith.select %56, %57, %54 : vector<64x64xi1>, vector<64x64xf32>
    %c63_i32_24 = arith.constant 63 : i32
    %59 = tpu.dynamic_rotate %53 by %c63_i32_24 dim 0 : vector<64x64xf32>, i32 -> vector<64x64xf32>
    %cst_25 = arith.constant 0.000000e+00 : f32
    %60 = vector.shape_cast %20 : vector<64x1xi1> to vector<64x1xi1>
    %61 = vector.broadcast %60 : vector<64x1xi1> to vector<64x64xi1>
    %62 = vector.broadcast %cst_25 : f32 to vector<64x64xf32>
    %63 = arith.select %61, %62, %59 : vector<64x64xi1>, vector<64x64xf32>
    %64 = arith.truncf %58 : vector<64x64xf32> to vector<64x64xbf16>
    %c0_26 = arith.constant 0 : index
    %c0_27 = arith.constant 0 : index
    %c0_28 = arith.constant 0 : index
    %65 = vector.load %arg5[%c0_26, %c0_27, %c0_28] : memref<3x64x64xbf16, #tpu.memory_space<vmem>>, vector<1x64x64xbf16>
    %66 = vector.shape_cast %65 : vector<1x64x64xbf16> to vector<64x64xbf16>
    %cst_29 = arith.constant dense<0.000000e+00> : vector<64x64xf32>
    %67 = tpu.matmul %64, %66, %cst_29 {dimension_numbers = #tpu.dot_dimension_numbers<[1], [0], [0], [1], [0, 0, 1, 1], [], []>} : vector<64x64xbf16>, vector<64x64xbf16>, vector<64x64xf32> -> vector<64x64xf32>
    %68 = arith.truncf %53 : vector<64x64xf32> to vector<64x64xbf16>
    %c1_30 = arith.constant 1 : index
    %c0_31 = arith.constant 0 : index
    %c0_32 = arith.constant 0 : index
    %69 = vector.load %arg5[%c1_30, %c0_31, %c0_32] : memref<3x64x64xbf16, #tpu.memory_space<vmem>>, vector<1x64x64xbf16>
    %70 = vector.shape_cast %69 : vector<1x64x64xbf16> to vector<64x64xbf16>
    %cst_33 = arith.constant dense<0.000000e+00> : vector<64x64xf32>
    %71 = tpu.matmul %68, %70, %cst_33 {dimension_numbers = #tpu.dot_dimension_numbers<[1], [0], [0], [1], [0, 0, 1, 1], [], []>} : vector<64x64xbf16>, vector<64x64xbf16>, vector<64x64xf32> -> vector<64x64xf32>
    %72 = arith.addf %67, %71 : vector<64x64xf32>
    %73 = arith.truncf %63 : vector<64x64xf32> to vector<64x64xbf16>
    %c2_34 = arith.constant 2 : index
    %c0_35 = arith.constant 0 : index
    %c0_36 = arith.constant 0 : index
    %74 = vector.load %arg5[%c2_34, %c0_35, %c0_36] : memref<3x64x64xbf16, #tpu.memory_space<vmem>>, vector<1x64x64xbf16>
    %75 = vector.shape_cast %74 : vector<1x64x64xbf16> to vector<64x64xbf16>
    %cst_37 = arith.constant dense<0.000000e+00> : vector<64x64xf32>
    %76 = tpu.matmul %73, %75, %cst_37 {dimension_numbers = #tpu.dot_dimension_numbers<[1], [0], [0], [1], [0, 0, 1, 1], [], []>} : vector<64x64xbf16>, vector<64x64xbf16>, vector<64x64xf32> -> vector<64x64xf32>
    %77 = arith.addf %72, %76 : vector<64x64xf32>
    %c0_38 = arith.constant 0 : index
    %c0_39 = arith.constant 0 : index
    %78 = vector.load %arg6[%c0_38, %c0_39] : memref<1x64xf32, #tpu.memory_space<vmem>>, vector<1x64xf32>
    %79 = vector.broadcast %78 : vector<1x64xf32> to vector<64x64xf32>
    %80 = arith.mulf %77, %79 : vector<64x64xf32>
    %c0_40 = arith.constant 0 : index
    %c0_41 = arith.constant 0 : index
    %81 = vector.load %arg7[%c0_40, %c0_41] : memref<1x64xf32, #tpu.memory_space<vmem>>, vector<1x64xf32>
    %82 = vector.broadcast %81 : vector<1x64xf32> to vector<64x64xf32>
    %83 = arith.addf %80, %82 : vector<64x64xf32>
    %cst_42 = arith.constant 0.000000e+00 : f32
    %84 = vector.broadcast %cst_42 : f32 to vector<64x64xf32>
    %85 = arith.maximumf %83, %84 : vector<64x64xf32>
    %c1_i32_43 = arith.constant 1 : i32
    %86 = tpu.dynamic_rotate %85 by %c1_i32_43 dim 0 : vector<64x64xf32>, i32 -> vector<64x64xf32>
    %cst_44 = arith.constant 0.000000e+00 : f32
    %87 = vector.shape_cast %18 : vector<64x1xi1> to vector<64x1xi1>
    %88 = vector.broadcast %87 : vector<64x1xi1> to vector<64x64xi1>
    %89 = vector.broadcast %cst_44 : f32 to vector<64x64xf32>
    %90 = arith.select %88, %89, %86 : vector<64x64xi1>, vector<64x64xf32>
    %c63_i32_45 = arith.constant 63 : i32
    %91 = tpu.dynamic_rotate %85 by %c63_i32_45 dim 0 : vector<64x64xf32>, i32 -> vector<64x64xf32>
    %cst_46 = arith.constant 0.000000e+00 : f32
    %92 = vector.shape_cast %20 : vector<64x1xi1> to vector<64x1xi1>
    %93 = vector.broadcast %92 : vector<64x1xi1> to vector<64x64xi1>
    %94 = vector.broadcast %cst_46 : f32 to vector<64x64xf32>
    %95 = arith.select %93, %94, %91 : vector<64x64xi1>, vector<64x64xf32>
    %96 = arith.truncf %90 : vector<64x64xf32> to vector<64x64xbf16>
    %c0_47 = arith.constant 0 : index
    %c0_48 = arith.constant 0 : index
    %c0_49 = arith.constant 0 : index
    %97 = vector.load %arg8[%c0_47, %c0_48, %c0_49] : memref<3x64x128xbf16, #tpu.memory_space<vmem>>, vector<1x64x128xbf16>
    %98 = vector.shape_cast %97 : vector<1x64x128xbf16> to vector<64x128xbf16>
    %cst_50 = arith.constant dense<0.000000e+00> : vector<64x128xf32>
    %99 = tpu.matmul %96, %98, %cst_50 {dimension_numbers = #tpu.dot_dimension_numbers<[1], [0], [0], [1], [0, 0, 1, 1], [], []>} : vector<64x64xbf16>, vector<64x128xbf16>, vector<64x128xf32> -> vector<64x128xf32>
    %100 = arith.truncf %85 : vector<64x64xf32> to vector<64x64xbf16>
    %c1_51 = arith.constant 1 : index
    %c0_52 = arith.constant 0 : index
    %c0_53 = arith.constant 0 : index
    %101 = vector.load %arg8[%c1_51, %c0_52, %c0_53] : memref<3x64x128xbf16, #tpu.memory_space<vmem>>, vector<1x64x128xbf16>
    %102 = vector.shape_cast %101 : vector<1x64x128xbf16> to vector<64x128xbf16>
    %cst_54 = arith.constant dense<0.000000e+00> : vector<64x128xf32>
    %103 = tpu.matmul %100, %102, %cst_54 {dimension_numbers = #tpu.dot_dimension_numbers<[1], [0], [0], [1], [0, 0, 1, 1], [], []>} : vector<64x64xbf16>, vector<64x128xbf16>, vector<64x128xf32> -> vector<64x128xf32>
    %104 = arith.addf %99, %103 : vector<64x128xf32>
    %105 = arith.truncf %95 : vector<64x64xf32> to vector<64x64xbf16>
    %c2_55 = arith.constant 2 : index
    %c0_56 = arith.constant 0 : index
    %c0_57 = arith.constant 0 : index
    %106 = vector.load %arg8[%c2_55, %c0_56, %c0_57] : memref<3x64x128xbf16, #tpu.memory_space<vmem>>, vector<1x64x128xbf16>
    %107 = vector.shape_cast %106 : vector<1x64x128xbf16> to vector<64x128xbf16>
    %cst_58 = arith.constant dense<0.000000e+00> : vector<64x128xf32>
    %108 = tpu.matmul %105, %107, %cst_58 {dimension_numbers = #tpu.dot_dimension_numbers<[1], [0], [0], [1], [0, 0, 1, 1], [], []>} : vector<64x64xbf16>, vector<64x128xbf16>, vector<64x128xf32> -> vector<64x128xf32>
    %109 = arith.addf %104, %108 : vector<64x128xf32>
    %c0_59 = arith.constant 0 : index
    %c0_60 = arith.constant 0 : index
    %110 = vector.load %arg9[%c0_59, %c0_60] : memref<1x128xf32, #tpu.memory_space<vmem>>, vector<1x128xf32>
    %111 = vector.broadcast %110 : vector<1x128xf32> to vector<64x128xf32>
    %112 = arith.mulf %109, %111 : vector<64x128xf32>
    %c0_61 = arith.constant 0 : index
    %c0_62 = arith.constant 0 : index
    %113 = vector.load %arg10[%c0_61, %c0_62] : memref<1x128xf32, #tpu.memory_space<vmem>>, vector<1x128xf32>
    %114 = vector.broadcast %113 : vector<1x128xf32> to vector<64x128xf32>
    %115 = arith.addf %112, %114 : vector<64x128xf32>
    %cst_63 = arith.constant 0.000000e+00 : f32
    %116 = vector.broadcast %cst_63 : f32 to vector<64x128xf32>
    %117 = arith.maximumf %115, %116 : vector<64x128xf32>
    %c1_i32_64 = arith.constant 1 : i32
    %118 = tpu.dynamic_rotate %117 by %c1_i32_64 dim 0 : vector<64x128xf32>, i32 -> vector<64x128xf32>
    %cst_65 = arith.constant 0.000000e+00 : f32
    %119 = vector.shape_cast %18 : vector<64x1xi1> to vector<64x1xi1>
    %120 = vector.broadcast %119 : vector<64x1xi1> to vector<64x128xi1>
    %121 = vector.broadcast %cst_65 : f32 to vector<64x128xf32>
    %122 = arith.select %120, %121, %118 : vector<64x128xi1>, vector<64x128xf32>
    %c63_i32_66 = arith.constant 63 : i32
    %123 = tpu.dynamic_rotate %117 by %c63_i32_66 dim 0 : vector<64x128xf32>, i32 -> vector<64x128xf32>
    %cst_67 = arith.constant 0.000000e+00 : f32
    %124 = vector.shape_cast %20 : vector<64x1xi1> to vector<64x1xi1>
    %125 = vector.broadcast %124 : vector<64x1xi1> to vector<64x128xi1>
    %126 = vector.broadcast %cst_67 : f32 to vector<64x128xf32>
    %127 = arith.select %125, %126, %123 : vector<64x128xi1>, vector<64x128xf32>
    %128 = arith.truncf %122 : vector<64x128xf32> to vector<64x128xbf16>
    %c0_68 = arith.constant 0 : index
    %c0_69 = arith.constant 0 : index
    %c0_70 = arith.constant 0 : index
    %129 = vector.load %arg11[%c0_68, %c0_69, %c0_70] : memref<3x128x128xbf16, #tpu.memory_space<vmem>>, vector<1x128x128xbf16>
    %130 = vector.shape_cast %129 : vector<1x128x128xbf16> to vector<128x128xbf16>
    %cst_71 = arith.constant dense<0.000000e+00> : vector<64x128xf32>
    %131 = tpu.matmul %128, %130, %cst_71 {dimension_numbers = #tpu.dot_dimension_numbers<[1], [0], [0], [1], [0, 0, 1, 1], [], []>} : vector<64x128xbf16>, vector<128x128xbf16>, vector<64x128xf32> -> vector<64x128xf32>
    %132 = arith.truncf %117 : vector<64x128xf32> to vector<64x128xbf16>
    %c1_72 = arith.constant 1 : index
    %c0_73 = arith.constant 0 : index
    %c0_74 = arith.constant 0 : index
    %133 = vector.load %arg11[%c1_72, %c0_73, %c0_74] : memref<3x128x128xbf16, #tpu.memory_space<vmem>>, vector<1x128x128xbf16>
    %134 = vector.shape_cast %133 : vector<1x128x128xbf16> to vector<128x128xbf16>
    %cst_75 = arith.constant dense<0.000000e+00> : vector<64x128xf32>
    %135 = tpu.matmul %132, %134, %cst_75 {dimension_numbers = #tpu.dot_dimension_numbers<[1], [0], [0], [1], [0, 0, 1, 1], [], []>} : vector<64x128xbf16>, vector<128x128xbf16>, vector<64x128xf32> -> vector<64x128xf32>
    %136 = arith.addf %131, %135 : vector<64x128xf32>
    %137 = arith.truncf %127 : vector<64x128xf32> to vector<64x128xbf16>
    %c2_76 = arith.constant 2 : index
    %c0_77 = arith.constant 0 : index
    %c0_78 = arith.constant 0 : index
    %138 = vector.load %arg11[%c2_76, %c0_77, %c0_78] : memref<3x128x128xbf16, #tpu.memory_space<vmem>>, vector<1x128x128xbf16>
    %139 = vector.shape_cast %138 : vector<1x128x128xbf16> to vector<128x128xbf16>
    %cst_79 = arith.constant dense<0.000000e+00> : vector<64x128xf32>
    %140 = tpu.matmul %137, %139, %cst_79 {dimension_numbers = #tpu.dot_dimension_numbers<[1], [0], [0], [1], [0, 0, 1, 1], [], []>} : vector<64x128xbf16>, vector<128x128xbf16>, vector<64x128xf32> -> vector<64x128xf32>
    %141 = arith.addf %136, %140 : vector<64x128xf32>
    %c0_80 = arith.constant 0 : index
    %c0_81 = arith.constant 0 : index
    %142 = vector.load %arg12[%c0_80, %c0_81] : memref<1x128xf32, #tpu.memory_space<vmem>>, vector<1x128xf32>
    %143 = vector.broadcast %142 : vector<1x128xf32> to vector<64x128xf32>
    %144 = arith.mulf %141, %143 : vector<64x128xf32>
    %c0_82 = arith.constant 0 : index
    %c0_83 = arith.constant 0 : index
    %145 = vector.load %arg13[%c0_82, %c0_83] : memref<1x128xf32, #tpu.memory_space<vmem>>, vector<1x128xf32>
    %146 = vector.broadcast %145 : vector<1x128xf32> to vector<64x128xf32>
    %147 = arith.addf %144, %146 : vector<64x128xf32>
    %cst_84 = arith.constant 0.000000e+00 : f32
    %148 = vector.broadcast %cst_84 : f32 to vector<64x128xf32>
    %149 = arith.maximumf %147, %148 : vector<64x128xf32>
    %150 = vector.shape_cast %149 : vector<64x128xf32> to vector<8x8x128xf32>
    %cst_85 = arith.constant dense<0.000000e+00> : vector<8x128xf32>
    %151 = vector.multi_reduction <add>, %150, %cst_85 [1] : vector<8x8x128xf32> to vector<8x128xf32>
    %cst_86 = arith.constant 1.250000e-01 : f32
    %152 = vector.broadcast %cst_86 : f32 to vector<8x128xf32>
    %153 = arith.mulf %151, %152 : vector<8x128xf32>
    %154 = arith.truncf %153 : vector<8x128xf32> to vector<8x128xbf16>
    %c0_87 = arith.constant 0 : index
    %c0_88 = arith.constant 0 : index
    %155 = vector.load %arg14[%c0_87, %c0_88] : memref<128x128xbf16, #tpu.memory_space<vmem>>, vector<128x128xbf16>
    %cst_89 = arith.constant dense<0.000000e+00> : vector<8x128xf32>
    %156 = tpu.matmul %154, %155, %cst_89 {dimension_numbers = #tpu.dot_dimension_numbers<[1], [0], [0], [1], [0, 0, 1, 1], [], []>} : vector<8x128xbf16>, vector<128x128xbf16>, vector<8x128xf32> -> vector<8x128xf32>
    %c0_90 = arith.constant 0 : index
    %c0_91 = arith.constant 0 : index
    %157 = vector.load %arg15[%c0_90, %c0_91] : memref<1x128xf32, #tpu.memory_space<vmem>>, vector<1x128xf32>
    %158 = vector.broadcast %157 : vector<1x128xf32> to vector<8x128xf32>
    %159 = arith.addf %156, %158 : vector<8x128xf32>
    %c0_92 = arith.constant 0 : index
    %c0_93 = arith.constant 0 : index
    %160 = vector.load %arg16[%c0_92, %c0_93] : memref<8x128xf32, #tpu.memory_space<vmem>>, vector<8x128xf32>
    tpu.vector_store %arg16[%c0_92, %c0_93], %159 {strides = array<i32>} : memref<8x128xf32, #tpu.memory_space<vmem>>, vector<8x128xf32>,
    return
  }
  func.func @transform_0(%arg0: i32) -> (i32, i32) {
    %c0_i32 = arith.constant 0 : i32
    %c0_i32_0 = arith.constant 0 : i32
    return %arg0, %c0_i32 : i32, i32
  }
  func.func @transform_1(%arg0: i32) -> (i32, i32, i32) {
    %c0_i32 = arith.constant 0 : i32
    %c0_i32_0 = arith.constant 0 : i32
    %c0_i32_1 = arith.constant 0 : i32
    %c0_i32_2 = arith.constant 0 : i32
    return %c0_i32, %c0_i32_0, %c0_i32_1 : i32, i32, i32
  }
  func.func @transform_2(%arg0: i32) -> (i32, i32) {
    %c0_i32 = arith.constant 0 : i32
    %c0_i32_0 = arith.constant 0 : i32
    %c0_i32_1 = arith.constant 0 : i32
    return %c0_i32, %c0_i32_0 : i32, i32
  }
  func.func @transform_3(%arg0: i32) -> (i32, i32) {
    %c0_i32 = arith.constant 0 : i32
    %c0_i32_0 = arith.constant 0 : i32
    %c0_i32_1 = arith.constant 0 : i32
    return %c0_i32, %c0_i32_0 : i32, i32
  }
  func.func @transform_4(%arg0: i32) -> (i32, i32, i32) {
    %c0_i32 = arith.constant 0 : i32
    %c0_i32_0 = arith.constant 0 : i32
    %c0_i32_1 = arith.constant 0 : i32
    %c0_i32_2 = arith.constant 0 : i32
    return %c0_i32, %c0_i32_0, %c0_i32_1 : i32, i32, i32
  }
  func.func @transform_5(%arg0: i32) -> (i32, i32) {
    %c0_i32 = arith.constant 0 : i32
    %c0_i32_0 = arith.constant 0 : i32
    %c0_i32_1 = arith.constant 0 : i32
    return %c0_i32, %c0_i32_0 : i32, i32
  }
  func.func @transform_6(%arg0: i32) -> (i32, i32) {
    %c0_i32 = arith.constant 0 : i32
    %c0_i32_0 = arith.constant 0 : i32
    %c0_i32_1 = arith.constant 0 : i32
    return %c0_i32, %c0_i32_0 : i32, i32
  }
  func.func @transform_7(%arg0: i32) -> (i32, i32, i32) {
    %c0_i32 = arith.constant 0 : i32
    %c0_i32_0 = arith.constant 0 : i32
    %c0_i32_1 = arith.constant 0 : i32
    %c0_i32_2 = arith.constant 0 : i32
    return %c0_i32, %c0_i32_0, %c0_i32_1 : i32, i32, i32
  }
  func.func @transform_8(%arg0: i32) -> (i32, i32) {
    %c0_i32 = arith.constant 0 : i32
    %c0_i32_0 = arith.constant 0 : i32
    %c0_i32_1 = arith.constant 0 : i32
    return %c0_i32, %c0_i32_0 : i32, i32
  }
  func.func @transform_9(%arg0: i32) -> (i32, i32) {
    %c0_i32 = arith.constant 0 : i32
    %c0_i32_0 = arith.constant 0 : i32
    %c0_i32_1 = arith.constant 0 : i32
    return %c0_i32, %c0_i32_0 : i32, i32
  }
  func.func @transform_10(%arg0: i32) -> (i32, i32, i32) {
    %c0_i32 = arith.constant 0 : i32
    %c0_i32_0 = arith.constant 0 : i32
    %c0_i32_1 = arith.constant 0 : i32
    %c0_i32_2 = arith.constant 0 : i32
    return %c0_i32, %c0_i32_0, %c0_i32_1 : i32, i32, i32
  }
  func.func @transform_11(%arg0: i32) -> (i32, i32) {
    %c0_i32 = arith.constant 0 : i32
    %c0_i32_0 = arith.constant 0 : i32
    %c0_i32_1 = arith.constant 0 : i32
    return %c0_i32, %c0_i32_0 : i32, i32
  }
  func.func @transform_12(%arg0: i32) -> (i32, i32) {
    %c0_i32 = arith.constant 0 : i32
    %c0_i32_0 = arith.constant 0 : i32
    %c0_i32_1 = arith.constant 0 : i32
    return %c0_i32, %c0_i32_0 : i32, i32
  }
  func.func @transform_13(%arg0: i32) -> (i32, i32) {
    %c0_i32 = arith.constant 0 : i32
    %c0_i32_0 = arith.constant 0 : i32
    %c0_i32_1 = arith.constant 0 : i32
    return %c0_i32, %c0_i32_0 : i32, i32
  }
  func.func @transform_14(%arg0: i32) -> (i32, i32) {
    %c0_i32 = arith.constant 0 : i32
    %c0_i32_0 = arith.constant 0 : i32
    %c0_i32_1 = arith.constant 0 : i32
    return %c0_i32, %c0_i32_0 : i32, i32
  }
  func.func @transform_15(%arg0: i32) -> (i32, i32) {
    %c0_i32 = arith.constant 0 : i32
    %c0_i32_0 = arith.constant 0 : i32
    return %arg0, %c0_i32 : i32, i32
  }
}

</mosaic_0001>

<bundles_post_ra>
// kernel: tpu_custom_call.1
= control target key start
LH: loop header
LB: loop body
LE: loop exit
PB: predicated region body
PF: predicated region fallthrough
CT: control target
= control target key end

     0   :  { %s3909_s0 = inlined_call_operand.vmem [shape: f32[256,32], index: 0, kind: input, shape index: {}]   ;;  %s3910_s1 = inlined_call_operand.hbm [shape: bf16[3,32,64], index: 1, kind: input, shape index: {}]   ;;  %s3911_s2 = inlined_call_operand.vmem [shape: f32[1,64], index: 2, kind: input, shape index: {}]   ;;  %s3912_s3 = inlined_call_operand.vmem [shape: f32[1,64], index: 3, kind: input, shape index: {}]   ;;  %s3913_s4 = inlined_call_operand.vmem [shape: bf16[3,64,64], index: 4, kind: input, shape index: {}]   ;;  %s3914_s5 = inlined_call_operand.vmem [shape: f32[1,64], index: 5, kind: input, shape index: {}]   ;;  %s3915_s6 = inlined_call_operand.vmem [shape: f32[1,64], index: 6, kind: input, shape index: {}]   ;;  %s3916_s7 = inlined_call_operand.hbm [shape: bf16[3,64,128], index: 7, kind: input, shape index: {}]   ;;  %s3917_s8 = inlined_call_operand.vmem [shape: f32[1,128], index: 8, kind: input, shape index: {}]   ;;  %s3918_s9 = inlined_call_operand.vmem [shape: f32[1,128], index: 9, kind: input, shape index: {}]   ;;  %s3919_s10 = inlined_call_operand.vmem [shape: bf16[3,128,128], index: 10, kind: input, shape index: {}]   ;;  %s3920_s11 = inlined_call_operand.vmem [shape: f32[1,128], index: 11, kind: input, shape index: {}]   ;;  %s3921_s12 = inlined_call_operand.vmem [shape: f32[1,128], index: 12, kind: input, shape index: {}]   ;;  %s3922_s13 = inlined_call_operand.hbm [shape: bf16[128,128], index: 13, kind: input, shape index: {}]   ;;  %s3923_s14 = inlined_call_operand.vmem [shape: f32[1,128], index: 14, kind: input, shape index: {}]   ;;  %s3924_s15 = inlined_call_operand.hbm [shape: f32[32,128], index: 15, kind: output, shape index: {}]  }
   0x1   :  { %3950 = sst [smem:[#allocation18_spill]] %s3910_s1 }
   0x2   :  { %3951 = sst [smem:[#allocation19_spill]] %s3916_s7 }
   0x3   :  { %3952 = sst [smem:[#allocation20_spill]] %s3923_s14 }
   0x4   :  { %20 = vsyncpa [#allocation3], 0 }
   0x5   :  { %21 = vsyncpa [#allocation6], 0 }
   0x6   :  { %22 = vsyncpa [#allocation4], 0 }
   0x7   :  { %24 = vsyncpa [#allocation4 + $0x1], 0  ;;  %s3070_s18 = smov 0   ;;  %s3072_s19 = smov 0  }
   0x8   :  { %s3074_s20 = smov 0   ;;  %s3076_s21 = smov 0  }
   0x9 LB: > { %3953 = sst [smem:[#allocation12_spill]] %s2971_s18  ;;  %s3091_s22 = sadd.s32 4294967295, %s2983_s21   ;;  %s2983_s21 = sphi %s3076_s21, %s4061_s21   ;;  %s2979_s20 = sphi %s3074_s20, %s4063_s20   ;;  %s2975_s19 = sphi %s3072_s19, %s4065_s19   ;;  %s2971_s18 = sphi %s3070_s18, %s4064_s18  }
   0xa   : > { %3954 = sst [smem:[#allocation13_spill]] %s2979_s20  ;;  %s2291_s23 = sadd.s32 4294967294, %s2983_s21  }
   0xb   : > { %3955 = sst [smem:[#allocation14_spill]] %s2983_s21  ;;  %s3095_s24 = sadd.s32 1, %s2983_s21  }
   0xc   : > { %3956 = sst [smem:[#allocation15_spill]] %s3095_s24  ;;  %s357_s25 = sadd.s32 1, %s2979_s20 }
   0xd   : > { %s354_s26 = ssub.s32 %s2983_s21, %s3095_s24  ;;  %p367_p0 = scmp.ne.s32.totalorder %s2979_s20, %s2975_s19 }
   0xe   : > { %p355_p1 = scmp.eq.s32.totalorder %s354_s26, 0  ;;  %p368_p2 = scmp.eq.s32.totalorder %s3091_s22, 3 }
   0xf   : > { %p373_p3 = scmp.ne.s32.totalorder %s2975_s19, %s2971_s18  ;;  %p374_p4 = scmp.eq.s32.totalorder %s2291_s23, 3 }
  0x10   : > { %s3106_s27 = scalar_select %p355_p1, %s2979_s20, %s357_s25  }
  0x11   : > { %p3108_p5 = por %p368_p2, %p367_p0  ;;  %p3112_p6 = por %p374_p4, %p373_p3 }
  0x12   : > { %3957 = sst [smem:[#allocation16_spill]] %s3106_s27  ;;  %p2292_p7 = scmp.ge.s32.totalorder %s2983_s21, 1 }
  0x13   : > { %s3959_s29 = scalar_select %p3112_p6, 1, 0 }
  0x14   : > { %p381_p8 = scmp.lt.s32.totalorder %s2983_s21, 5  ;;  %p2770_p9 = scmp.eq.s32.totalorder %s3091_s22, 0 }
  0x15   : > { %3960 = sst [smem:[#allocation17_spill]] %s3959_s29  ;;  %s2985_s24 = smov [#allocation5]  }
  0x16   : > { %p3119_p10 = pnand %p2292_p7, %p381_p8  ;;  %s3962_s7 = sld [smem:[#allocation19_spill]] }
  0x17   : > { %s3963_s1 = sld [smem:[#allocation18_spill]]  ;;  %s423_s29 = sshll.u32 %s2985_s24, 4  ;;  %s424_s29 = int_to_ptr.vmem [resolvable:$true] %s423_s29 }
  0x18   : > { %p2756_p11 = pneg %p3119_p10  ;;  %s2986_s16 = smov 64  }
  0x19   : > { %s2987_s17 = smov 4   ;;  %s2989_s21 = smov [#allocation7]  }
  0x1a   : > { %p3133_p12 = pnand %p2770_p9, %p2756_p11  ;;  %s452_s14 = sshll.u32 %s2989_s21, 4  ;;  %s453_s14 = int_to_ptr.vmem [resolvable:$true] %s452_s14 }
  0x1c   : > { %s421_s23 = sshll.u32 %s3962_s7, 4  ;;  %s2988_s7 = smov [#allocation2]   ;;  %s422_s23 = int_to_ptr.hbm [resolvable:$true] %s421_s23 }
  0x1d   : > { %s392_s27 = sshll.u32 %s3963_s1, 4  ;;  %s394_s18 = sshll.u32 %s2988_s7, 4  ;;  %s393_s27 = int_to_ptr.hbm [resolvable:$true] %s392_s27  ;;  %s395_s18 = int_to_ptr.vmem [resolvable:$true] %s394_s18 }
  0x1e   : > { %2762 = dma.hbm_to_vmem [thread:$0]  (!%p3133_p12), %s422_s23, 1536, %s424_s29, [#allocation6], %s2986_s16, %s2986_s16, %s2987_s17  }
  0x1f   : > { %s450_s1 = sshll.u32 %s3922_s13, 4  ;;  %480 = sbr.rel (%p3119_p10) target bundleno = 1010 (0x3f2), region = 80  ;;  %s451_s1 = int_to_ptr.hbm [resolvable:$true] %s450_s1 }
  0x20   : > { %2759 = dma.hbm_to_vmem [thread:$0]  (!%p3133_p12), %s393_s27, 768, %s395_s18, [#allocation3], %s2986_s16, %s2986_s16, %s2987_s17  }
  0x21   : > { %2765 = dma.hbm_to_vmem [thread:$0]  (!%p3133_p12), %s451_s1, 1024, %s453_s14, [#allocation6], %s2986_s16, %s2986_s16, %s2987_s17  }
  0x24   : > { %2958 = dma.done.wait (%p2770_p9), [#allocation3], 768  }
  0x25   : > { %2960 = vsyncadd (%p2770_p9), [#allocation3], 4294966528 }
  0x26   : > { %2962 = dma.done.wait (%p2770_p9), [#allocation6], 2560  }
  0x27   : > { %2964 = vsyncadd (%p2770_p9), [#allocation6], 4294964736  ;;  %s3157_s7 = sshll.u32 %s3091_s22, 3  ;;  %v546_v0 = vlaneseq  ;;  %v2683_v5 = vld [vmem:[#allocation2 + $0x18] sm:$0xff]  ;;  %v2681_v6 = vld [vmem:[#allocation2 + $0x8] sm:$0xff]  ;;  %v3969_v21 = vmov 0 }
  0x28   : > { %p540_p13 = scmp.lt.s32.totalorder %s3157_s7, 31  ;;  %v2685_v7 = vld [vmem:[#allocation2 + $0x28] sm:$0xff]  ;;  %v2682_v8 = vld [vmem:[#allocation2 + $0x10] sm:$0xff]  ;;  %v2680_v9 = vld [vmem:[#allocation2] sm:$0xff]  ;;  %805 = vmatpush.bf16.msra.mxu0 %v2683_v5  ;;  %858 = vmatpush.bf16.msra.mxu1 %v2681_v6  ;;  %vm3932_vm6 = vcmask 261120   ;;  %v3973_v46 = vmov 0  ;;  %s2196_s27 = scalar_lea.hbm %s3924_s15, %s3157_s7 }
  0x29   : > { %v3160_v1 = vshrl.u32 %v546_v0, 7  ;;  %920 = vmatpush.bf16.msra.mxu2 %v2685_v7  ;;  %v2684_v15 = vld [vmem:[#allocation2 + $0x20] sm:$0xff]  ;;  %v3975_v47 = vmov 0  ;;  %v2711_v14 = vld [vmem:[%s3919_s10 + $0x8] sm:$0xff]  ;;  %s536_s20 = sand.u32 1, %s2975_s19   ;;  %s4057_s23 = sld [smem:[#allocation20_spill]] }
  0x2a   : > { %s541_s1 = scalar_select %p540_p13, %s3157_s7, 31 }
  0x2b   : > { %v548_v2 = vadd.s32 8, %v3160_v1  ;;  %v559_v3 = vand.u32 7, %v3160_v1  ;;  %vm3939_vm0 = vcmp.lt.s32.totalorder %v3160_v1, 1  ;;  %vm3931_vm2 = vcmp.lt.s32.totalorder %v3160_v1, 7  ;;  %s2200_s25 = sshll.u32 %s2196_s27, 4  ;;  %s2186_s26 = scalar_lea.sflag [#allocation4], %s536_s20  ;;  %s2201_s25 = int_to_ptr.hbm [resolvable:$true] %s2200_s25 }
  0x2c   : > { %s2303_s14 = sshll.u32 %s541_s1, 3  ;;  %806 = vmatpush.bf16.msra.mxu0 %v2682_v8  ;;  %859 = vmatpush.bf16.msra.mxu1 %v2680_v9  ;;  %v549_v34 = vadd.s32 16, %v3160_v1  ;;  %v550_v35 = vadd.s32 24, %v3160_v1  ;;  %v551_v62 = vadd.s32 32, %v3160_v1  ;;  %v552_v63 = vadd.s32 40, %v3160_v1  ;;  %s2927_s1 = sshra.s32 %s2201_s25, 4  ;;  %s2928_s1 = int_to_ptr.hbm [resolvable:$true] %s2927_s1 }
  0x2d   : > { %s3168_s21 = scalar_lea.vmem %s3909_s0, %s2303_s14  ;;  %v566_v4 = vand.u32 7, %v548_v2  ;;  %vm3183_vm3 = vcmp.eq.s32.totalorder %v559_v3, 7  ;;  %vm3190_vm4 = vcmp.eq.s32.totalorder %v559_v3, 0  ;;  %921 = vmatpush.bf16.msra.mxu2 %v2684_v15  ;;  %s2929_s14 = scalar_lea.hbm %s2928_s1, 8 }
  0x2e   : > { %v3172_v10 = vld [vmem:[%s3168_s21] sm:$0xff]  ;;  %v668_v11 = vld [vmem:[%s3168_s21 + $0x8] sm:$0xff]  ;;  %v3180_v13 = vld [vmem:[%s3168_s21 + $0x38] sm:$0xff]  ;;  %v3970_v21 = vsel %vm3190_vm4, 4294967295, %v3969_v21  ;;  %v573_v40 = vand.u32 7, %v549_v34  ;;  %v580_v41 = vand.u32 7, %v550_v35  ;;  %p2930_p0 = scmp.ne.s32.totalorder %s2928_s1, %s2929_s14  ;;  %p2934_p3 = scmp.lt.s32.totalorder %s2928_s1, %s3924_s15 }
  0x2f   : > { %vm3175_vm1 = vcmp.eq.s32.totalorder %v566_v4, 0  ;;  %v675_v16 = vrot.slane %v3172_v10, 7  ;;  %v676_v17 = vrot.slane %v668_v11, 7  ;;  %v716_v18 = vrot.slane %v3172_v10, 1  ;;  %v669_v20 = vld [vmem:[%s3168_s21 + $0x10] sm:$0xff]  ;;  %v670_v38 = vld [vmem:[%s3168_s21 + $0x18] sm:$0xff] }
  0x30   : > { %v717_v19 = vrot.slane %v668_v11, 1  ;;  %v682_v22 = vrot.slane %v3180_v13, 7  ;;  %vm3195_vm5 = vcmp.eq.s32.totalorder %v566_v4, 7  ;;  %v718_v24 = vrot.slane %v669_v20, 1  ;;  %v671_v39 = vld [vmem:[%s3168_s21 + $0x20] sm:$0xff]  ;;  %v672_v61 = vld [vmem:[%s3168_s21 + $0x28] sm:$0xff]  ;;  %p2931_p1 = pnand %p2930_p0, %p3108_p5 }
  0x31   : > { %v765_v25 = vpack.c.bf16 %v668_v11, %v3172_v10  ;;  %v690_v26 = vsel %vm3939_vm0, %v675_v16, %v676_v17  ;;  %v678_v42 = vrot.slane %v670_v38, 7  ;;  %v719_v43 = vrot.slane %v670_v38, 1  ;;  %v673_v0 = vld [vmem:[%s3168_s21 + $0x30] sm:$0xff]  ;;  %v2693_v10 = vld [vmem:[%s3913_s4 + $0x38] sm:$0xff]  ;;  %s2301_s21 = sshll.u32 %s536_s20, 3  ;;  %s2933_s22 = scalar_lea.hbm %s3924_s15, 32 }
  0x32   : > { %v731_v27 = vsel %vm3931_vm2, %v716_v18, %v717_v19  ;;  %v691_v28 = vsel %vm3939_vm0, %v682_v22, %v675_v16  ;;  %v709_v29 = vsel %vm3175_vm1, 0.0, %v690_v26  ;;  %v730_v30 = vsel %vm3931_vm2, %v717_v19, %v718_v24  ;;  %1097 = vmatpush.bf16.msra.mxu3 %v2693_v10  ;;  %s538_s16 = scalar_lea.vmem [#allocation8], %s2301_s21  ;;  %p2932_p2 = pneg %p2931_p1 }
  0x33   : > { %v749_v31 = vsel %vm3183_vm3, 0.0, %v731_v27  ;;  %v708_v32 = vsel %vm3190_vm4, 0.0, %v691_v28  ;;  %v750_v33 = vsel %vm3195_vm5, 0.0, %v730_v30  ;;  %2312 = vmatmul.msk.bf16.vlgmr.msra.gmra.mxu0 %vm3932_vm6, %v765_v25  ;;  %v677_v44 = vrot.slane %v669_v20, 7  ;;  %s2198_s17 = sshll.u32 %s538_s16, 4  ;;  %p2935_p4 = scmp.lt.s32.totalorder %s2933_s22, %s2929_s14  ;;  %s2199_s17 = int_to_ptr.vmem [resolvable:$true] %s2198_s17 }
  0x34   : > { %v757_v36 = vpack.c.bf16 %v709_v29, %v708_v32  ;;  %v881_v37 = vpack.c.bf16 %v750_v33, %v749_v31  ;;  %v720_v45 = vrot.slane %v671_v39, 1  ;;  %vm3227_vm7 = vcmp.eq.s32.totalorder %v573_v40, 0 }
  0x35   : > { %v3974_v46 = vsel %vm3227_vm7, 4294967295, %v3973_v46  ;;  %vm3231_vm8 = vcmp.eq.s32.totalorder %v580_v41, 0  ;;  %vm3235_vm9 = vcmp.eq.s32.totalorder %v573_v40, 7  ;;  %vm3239_vm10 = vcmp.eq.s32.totalorder %v580_v41, 7  ;;  %p2936_p7 = por %p2935_p4, %p2934_p3 }
  0x36   : > { %2324 = vmatmul.msk.bf16.vlgmr.msra.gmra.mxu1 %vm3932_vm6, %v757_v36  ;;  %2336 = vmatmul.msk.bf16.vlgmr.msra.gmra.mxu2 %vm3932_vm6, %v881_v37  ;;  %v3976_v47 = vsel %vm3231_vm8, 4294967295, %v3975_v47  ;;  %v688_v50 = vsel %vm3939_vm0, %v677_v44, %v678_v42  ;;  %v689_v51 = vsel %vm3939_vm0, %v676_v17, %v677_v44  ;;  %v728_v52 = vsel %vm3931_vm2, %v719_v43, %v720_v45 }
  0x37   : > { %v729_v53 = vsel %vm3931_vm2, %v718_v24, %v719_v43  ;;  %v710_v54 = vsel %vm3227_vm7, 0.0, %v689_v51  ;;  %v711_v55 = vsel %vm3231_vm8, 0.0, %v688_v50  ;;  %v752_v57 = vsel %vm3239_vm10, 0.0, %v728_v52  ;;  %p2937_p8 = pnand %p2936_p7, %p2932_p2 }
  0x38   : > { %v751_v56 = vsel %vm3235_vm9, 0.0, %v729_v53  ;;  %v766_v58 = vpack.c.bf16 %v670_v38, %v669_v20  ;;  %v758_v59 = vpack.c.bf16 %v711_v55, %v710_v54  ;;  %v680_v2 = vrot.slane %v672_v61, 7  ;;  %v2691_v55 = vld [vmem:[%s3913_s4 + $0x28] sm:$0xff] }
  0x39   : > { %v882_v60 = vpack.c.bf16 %v752_v57, %v751_v56  ;;  %v721_v3 = vrot.slane %v672_v61, 1  ;;  %v679_v4 = vrot.slane %v671_v39, 7  ;;  %v722_v5 = vrot.slane %v673_v0, 1  ;;  %v2697_v56 = vld [vmem:[%s3913_s4 + $0x58] sm:$0xff]  ;;  %v2690_v57 = vld [vmem:[%s3913_s4 + $0x20] sm:$0xff] }
  0x3a   : > { %v587_v6 = vand.u32 7, %v551_v62  ;;  %v594_v7 = vand.u32 7, %v552_v63  ;;  %v3981_v16 = vmov 0  ;;  %v3983_v17 = vmov 0  ;;  %1240 = vmatpush.bf16.msrb.mxu1 %v2697_v56  ;;  %v2694_v63 = vld [vmem:[%s3913_s4 + $0x40] sm:$0xff] }
  0x3b   : > { %v686_v8 = vsel %vm3939_vm0, %v679_v4, %v680_v2  ;;  %v687_v9 = vsel %vm3939_vm0, %v678_v42, %v679_v4  ;;  %v726_v11 = vsel %vm3931_vm2, %v721_v3, %v722_v5  ;;  %v727_v15 = vsel %vm3931_vm2, %v720_v45, %v721_v3 }
  0x3c   : > { %vm3274_vm11 = vcmp.eq.s32.totalorder %v587_v6, 0  ;;  %vm3278_vm12 = vcmp.eq.s32.totalorder %v594_v7, 0  ;;  %vm3282_vm13 = vcmp.eq.s32.totalorder %v587_v6, 7  ;;  %v3985_v19 = vmov 0  ;;  %v3377_v6 = vld [vmem:[%s3911_s2] ss:$0 sm:$0xff] }
  0x3d   : > { %v3982_v16 = vsel %vm3274_vm11, 4294967295, %v3981_v16  ;;  %v3984_v17 = vsel %vm3278_vm12, 4294967295, %v3983_v17  ;;  %v3986_v19 = vsel %vm3282_vm13, 4294967295, %v3985_v19  ;;  %vm3286_vm14 = vcmp.eq.s32.totalorder %v594_v7, 7 }
  0x3e   : > { %v3987_v20 = vmov 0  ;;  %v712_v24 = vsel %vm3274_vm11, 0.0, %v687_v9  ;;  %v713_v25 = vsel %vm3278_vm12, 0.0, %v686_v8  ;;  %v753_v26 = vsel %vm3282_vm13, 0.0, %v727_v15  ;;  %v3383_v8 = vld [vmem:[%s3912_s3] ss:$0 sm:$0xff] }
  0x3f   : > { %v3988_v20 = vsel %vm3286_vm14, 4294967295, %v3987_v20  ;;  %v754_v27 = vsel %vm3286_vm14, 0.0, %v726_v11  ;;  %v767_v28 = vpack.c.bf16 %v672_v61, %v671_v39  ;;  %v759_v29 = vpack.c.bf16 %v713_v25, %v712_v24  ;;  %v2688_v61 = vld [vmem:[%s3913_s4 + $0x10] sm:$0xff]  ;;  %v2687_v25 = vld [vmem:[%s3913_s4 + $0x8] sm:$0xff] }
  0x40   : > { %v883_v30 = vpack.c.bf16 %v754_v27, %v753_v26  ;;  %v553_v31 = vadd.s32 48, %v3160_v1  ;;  %v554_v32 = vadd.s32 56, %v3160_v1  ;;  %v681_v35 = vrot.slane %v673_v0, 7 }
  0x41   : > { %v723_v36 = vrot.slane %v3180_v13, 1  ;;  %v3993_v41 = vmov 0  ;;  %v3995_v42 = vmov 0  ;;  %vm3997_vm12 = vcmp.lt.s32.totalorder %v3160_v1, 7 }
  0x42   : > { %v601_v33 = vand.u32 7, %v553_v31  ;;  %v608_v34 = vand.u32 7, %v554_v32  ;;  %v684_v39 = vsel %vm3939_vm0, %v681_v35, %v682_v22  ;;  %v685_v40 = vsel %vm3939_vm0, %v680_v2, %v681_v35  ;;  %vm3998_vm7 = vmmov %vm3997_vm12 }
  0x43   : > { %2313 = vmatmul.msk.bf16.gmra.mxu0 %vm3932_vm6, %v766_v58  ;;  %v725_v43 = vsel %vm3997_vm12, %v722_v5, %v723_v36  ;;  %v732_v44 = vsel %vm3998_vm7, %v723_v36, %v716_v18  ;;  %v768_v52 = vpack.c.bf16 %v3180_v13, %v673_v0  ;;  %vm3999_vm12 = vcmask 261120   ;;  %v2692_v18 = vld [vmem:[%s3913_s4 + $0x30] sm:$0xff]  ;;  %v2689_v13 = vld [vmem:[%s3913_s4 + $0x18] sm:$0xff] }
  0x44   : > { %vm3304_vm15 = vcmp.eq.s32.totalorder %v601_v33, 0  ;;  %vm3308_vm2 = vcmp.eq.s32.totalorder %v608_v34, 0  ;;  %vm3322_vm11 = vcmp.eq.s32.totalorder %v608_v34, 7  ;;  %vm4000_vm0 = vmmov %vm3999_vm12  ;;  %1098 = vmatpush.bf16.msra.mxu3 %v2692_v18  ;;  %1162 = vmatpush.bf16.msrb.mxu0 %v2689_v13  ;;  %v2696_v58 = vld [vmem:[%s3913_s4 + $0x50] sm:$0xff]  ;;  %v2686_v18 = vld [vmem:[%s3913_s4] sm:$0xff] }
  0x45   : > { %v3996_v42 = vsel %vm3322_vm11, 4294967295, %v3995_v42  ;;  %v714_v22 = vsel %vm3304_vm15, 0.0, %v685_v40  ;;  %v715_v45 = vsel %vm3308_vm2, 0.0, %v684_v39  ;;  %v756_v51 = vsel %vm3322_vm11, 0.0, %v732_v44  ;;  %vm4001_vm7 = vmmov %vm4000_vm0  ;;  %1241 = vmatpush.bf16.msrb.mxu1 %v2696_v58 }
  0x46   : > { %2325 = vmatmul.msk.bf16.gmra.mxu1 %vm3932_vm6, %v758_v59  ;;  %2337 = vmatmul.msk.bf16.gmra.mxu2 %vm3932_vm6, %v882_v60  ;;  %v760_v53 = vpack.c.bf16 %v715_v45, %v714_v22  ;;  %v2695_v59 = vld [vmem:[%s3913_s4 + $0x48] sm:$0xff] }
  0x48   : > { %1099 = vmatpush.bf16.msra.mxu3 %v2691_v55  ;;  %1163 = vmatpush.bf16.msrb.mxu0 %v2688_v61 }
  0x49   : > { %1242 = vmatpush.bf16.msrb.mxu1 %v2695_v59 }
  0x4c   : > { %1100 = vmatpush.bf16.msra.mxu3 %v2690_v57  ;;  %1164 = vmatpush.bf16.msrb.mxu0 %v2687_v25 }
  0x4d   : > { %1243 = vmatpush.bf16.msrb.mxu1 %v2694_v63 }
  0x50   : > { %1165 = vmatpush.bf16.msrb.mxu0 %v2686_v18 }
  0x53   : > { %2314 = vmatmul.msk.bf16.gmra.mxu0 %vm3932_vm6, %v767_v28 }
  0x56   : > { %2326 = vmatmul.msk.bf16.gmra.mxu1 %vm3932_vm6, %v759_v29  ;;  %2338 = vmatmul.msk.bf16.gmra.mxu2 %vm3932_vm6, %v883_v30  ;;  %vm3318_vm6 = vcmp.eq.s32.totalorder %v601_v33, 7 }
  0x57   : > { %v3994_v41 = vsel %vm3318_vm6, 4294967295, %v3993_v41  ;;  %v755_v50 = vsel %vm3318_vm6, 0.0, %v725_v43 }
  0x58   : > { %v884_v54 = vpack.c.bf16 %v756_v51, %v755_v50 }
  0x63   : > { %2315 = vmatmul.msk.bf16.gmra.mxu0 %vm3999_vm12, %v768_v52  ;;  %vm4002_vm12 = vcmp.lt.s32.totalorder %v3160_v1, 7 }
  0x66   : > { %2327 = vmatmul.msk.bf16.gmra.mxu1 %vm4000_vm0, %v760_v53  ;;  %2339 = vmatmul.msk.bf16.gmra.mxu2 %vm4001_vm7, %v884_v54  ;;  %vm1080_vm0 = vcmask 523264   ;;  %vm4003_vm7 = vmmov %vm4002_vm12 }
  0xb0   : > { %v808_v60 = vpop.f32.mrf.mxu0 }
  0xb3   : > { %v861_v62 = vpop.f32.mrf.mxu1 }
  0xb4   : > { %v862_v0 = vadd.f32 %v861_v62, %v808_v60 }
  0xb8   : > { %v810_v3 = vpop.f32.mrf.mxu0 }
  0xb9   : > { %v923_v2 = vpop.f32.mrf.mxu2 }
  0xba   : > { %v943_v5 = vadd.f32 %v923_v2, %v862_v0 }
  0xbb   : > { %v863_v4 = vpop.f32.mrf.mxu1 }
  0xbc   : > { %v955_v7 = vmul.f32 %v3377_v6, %v943_v5  ;;  %v864_v9 = vadd.f32 %v863_v4, %v810_v3 }
  0xbe   : > { %v967_v27 = vadd.f32 %v3383_v8, %v955_v7 }
  0xc0   : > { %v813_v24 = vpop.f32.mrf.mxu0  ;;  %v3391_v31 = vmax.f32 %v967_v27, 0.0 }
  0xc1   : > { %v925_v11 = vpop.f32.mrf.mxu2 }
  0xc2   : > { %v944_v15 = vadd.f32 %v925_v11, %v864_v9  ;;  %v1007_v22 = vrot.slane %v3391_v31, 1 }
  0xc3   : > { %v866_v26 = vpop.f32.mrf.mxu1 }
  0xc4   : > { %v956_v28 = vmul.f32 %v3377_v6, %v944_v15  ;;  %v867_v30 = vadd.f32 %v866_v26, %v813_v24 }
  0xc6   : > { %v968_v29 = vadd.f32 %v3383_v8, %v956_v28 }
  0xc8   : > { %v3393_v32 = vmax.f32 %v968_v29, 0.0  ;;  %v815_v35 = vpop.f32.mrf.mxu0 }
  0xc9   : > { %v928_v33 = vpop.f32.mrf.mxu2 }
  0xca   : > { %v945_v34 = vadd.f32 %v928_v33, %v867_v30  ;;  %v1043_v36 = vpack.c.bf16 %v3393_v32, %v3391_v31  ;;  %v1008_v43 = vrot.slane %v3393_v32, 1 }
  0xcb   : > { %v868_v39 = vpop.f32.mrf.mxu1 }
  0xcc   : > { %v957_v40 = vmul.f32 %v3377_v6, %v945_v34  ;;  %2364 = vmatmul.msk.bf16.vlgmr.msra.gmra.mxu3 %vm1080_vm0, %v1043_v36  ;;  %v869_v50 = vadd.f32 %v868_v39, %v815_v35  ;;  %v1021_v10 = vsel %vm4002_vm12, %v1007_v22, %v1008_v43  ;;  %vm4004_vm12 = vmmov %vm4003_vm7 }
  0xcd   : > { %v1023_v57 = vsel %vm3183_vm3, 0.0, %v1021_v10 }
  0xce   : > { %v969_v44 = vadd.f32 %v3383_v8, %v957_v40 }
  0xd0   : > { %v3402_v45 = vmax.f32 %v969_v44, 0.0  ;;  %v818_v54 = vpop.f32.mrf.mxu0 }
  0xd1   : > { %v930_v51 = vpop.f32.mrf.mxu2 }
  0xd2   : > { %v1009_v52 = vrot.slane %v3402_v45, 1  ;;  %v946_v53 = vadd.f32 %v930_v51, %v869_v50 }
  0xd3   : > { %v871_v13 = vpop.f32.mrf.mxu1 }
  0xd4   : > { %v958_v55 = vmul.f32 %v3377_v6, %v946_v53  ;;  %v1020_v56 = vsel %vm4003_vm7, %v1008_v43, %v1009_v52  ;;  %v872_v60 = vadd.f32 %v871_v13, %v818_v54 }
  0xd5   : > { %v1024_v58 = vsel %vm3195_vm5, 0.0, %v1020_v56 }
  0xd6   : > { %v970_v59 = vadd.f32 %v3383_v8, %v958_v55  ;;  %v1187_v61 = vpack.c.bf16 %v1024_v58, %v1023_v57 }
  0xd8   : > { %v3420_v62 = vmax.f32 %v970_v59, 0.0  ;;  %2412 = vmatmul.msk.bf16.vlgmr.msrb.gmra.mxu1 %vm1080_vm0, %v1187_v61  ;;  %v820_v2 = vpop.f32.mrf.mxu0 }
  0xd9   : > { %v933_v63 = vpop.f32.mrf.mxu2 }
  0xda   : > { %v947_v0 = vadd.f32 %v933_v63, %v872_v60  ;;  %v1044_v3 = vpack.c.bf16 %v3420_v62, %v3402_v45  ;;  %v1010_v7 = vrot.slane %v3420_v62, 1 }
  0xdb   : > { %v873_v4 = vpop.f32.mrf.mxu1 }
  0xdc   : > { %v959_v5 = vmul.f32 %v3377_v6, %v947_v0  ;;  %2365 = vmatmul.msk.bf16.gmra.mxu3 %vm1080_vm0, %v1044_v3  ;;  %v874_v15 = vadd.f32 %v873_v4, %v820_v2  ;;  %v1019_v27 = vsel %vm4004_vm12, %v1009_v52, %v1010_v7  ;;  %vm4005_vm12 = vmmov %vm4003_vm7  ;;  %v984_v2 = vrot.slane %v3393_v32, 7 }
  0xdd   : > { %v1025_v34 = vsel %vm3235_vm9, 0.0, %v1019_v27 }
  0xde   : > { %v971_v9 = vadd.f32 %v3383_v8, %v959_v5  ;;  %v983_v5 = vrot.slane %v3391_v31, 7 }
  0xe0   : > { %v3429_v11 = vmax.f32 %v971_v9, 0.0  ;;  %v823_v28 = vpop.f32.mrf.mxu0 }
  0xe1   : > { %v935_v24 = vpop.f32.mrf.mxu2 }
  0xe2   : > { %v1011_v25 = vrot.slane %v3429_v11, 1  ;;  %v948_v26 = vadd.f32 %v935_v24, %v874_v15 }
  0xe3   : > { %v876_v29 = vpop.f32.mrf.mxu1 }
  0xe4   : > { %v960_v30 = vmul.f32 %v3377_v6, %v948_v26  ;;  %v1018_v33 = vsel %vm4003_vm7, %v1010_v7, %v1011_v25  ;;  %v877_v39 = vadd.f32 %v876_v29, %v823_v28 }
  0xe5   : > { %v1026_v35 = vsel %vm3239_vm10, 0.0, %v1018_v33  ;;  %v986_v33 = vrot.slane %v3420_v62, 7  ;;  %v987_v62 = vrot.slane %v3429_v11, 7 }
  0xe6   : > { %v972_v36 = vadd.f32 %v3383_v8, %v960_v30  ;;  %v1188_v40 = vpack.c.bf16 %v1026_v35, %v1025_v34  ;;  %v985_v34 = vrot.slane %v3402_v45, 7 }
  0xe8   : > { %v3442_v43 = vmax.f32 %v972_v36, 0.0  ;;  %2413 = vmatmul.msk.bf16.gmra.mxu1 %vm1080_vm0, %v1188_v40  ;;  %v825_v53 = vpop.f32.mrf.mxu0 }
  0xe9   : > { %v938_v44 = vpop.f32.mrf.mxu2 }
  0xea   : > { %v949_v50 = vadd.f32 %v938_v44, %v877_v39  ;;  %v1045_v51 = vpack.c.bf16 %v3442_v43, %v3429_v11  ;;  %v1012_v10 = vrot.slane %v3442_v43, 1  ;;  %v988_v45 = vrot.slane %v3442_v43, 7 }
  0xeb   : > { %v878_v54 = vpop.f32.mrf.mxu1 }
  0xec   : > { %v961_v52 = vmul.f32 %v3377_v6, %v949_v50  ;;  %2366 = vmatmul.msk.bf16.gmra.mxu3 %vm1080_vm0, %v1045_v51  ;;  %v879_v55 = vadd.f32 %v878_v54, %v825_v53  ;;  %v1017_v59 = vsel %vm4005_vm12, %v1011_v25, %v1012_v10  ;;  %vm4006_vm12 = vcmp.lt.s32.totalorder %v3160_v1, 1 }
  0xed   : > { %v1027_v63 = vsel %vm3282_vm13, 0.0, %v1017_v59  ;;  %v997_v15 = vsel %vm4006_vm12, %v983_v5, %v984_v2  ;;  %v2702_v59 = vld [vmem:[#allocation5 + $0x20] sm:$0xff] }
  0xee   : > { %v973_v18 = vadd.f32 %v3383_v8, %v961_v52  ;;  %v1000_v32 = vsel %vm3175_vm1, 0.0, %v997_v15 }
  0xf0   : > { %v981_v13 = vmax.f32 %v973_v18, 0.0 }
  0xf1   : > { %v940_v56 = vpop.f32.mrf.mxu2 }
  0xf2   : > { %v1013_v57 = vrot.slane %v981_v13, 1  ;;  %v950_v58 = vadd.f32 %v940_v56, %v879_v55  ;;  %v989_v54 = vrot.slane %v981_v13, 7  ;;  %v2705_v56 = vld [vmem:[#allocation5 + $0x38] sm:$0xff] }
  0xf3   : > { %1418 = vmatpush.bf16.msrb.mxu2 %v2705_v56 }
  0xf4   : > { %v962_v60 = vmul.f32 %v3377_v6, %v950_v58  ;;  %v1016_v61 = vsel %vm4003_vm7, %v1012_v10, %v1013_v57  ;;  %vm4007_vm7 = vmmov %vm4006_vm12  ;;  %v2709_v58 = vld [vmem:[#allocation5 + $0x58] sm:$0xff] }
  0xf5   : > { %v1028_v0 = vsel %vm3286_vm14, 0.0, %v1016_v61  ;;  %vm4008_vm14 = vcmp.lt.s32.totalorder %v3160_v1, 7  ;;  %v996_v31 = vsel %vm4007_vm7, %v984_v2, %v985_v34  ;;  %1561 = vmatpush.bf16.msra.mxu0 %v2709_v58  ;;  %v2701_v61 = vld [vmem:[#allocation5 + $0x18] sm:$0xff]  ;;  %v2707_v2 = vld [vmem:[#allocation5 + $0x48] sm:$0xff] }
  0xf6   : > { %v974_v3 = vadd.f32 %v3383_v8, %v962_v60  ;;  %v1189_v4 = vpack.c.bf16 %v1028_v0, %v1027_v63  ;;  %vm4009_vm12 = vmmov %vm4008_vm14  ;;  %v2708_v0 = vld [vmem:[#allocation5 + $0x50] sm:$0xff]  ;;  %1483 = vmatpush.bf16.msrb.mxu3 %v2701_v61 }
  0xf8   : > { %v982_v7 = vmax.f32 %v974_v3, 0.0  ;;  %2414 = vmatmul.msk.bf16.gmra.mxu1 %vm1080_vm0, %v1189_v4  ;;  %v2706_v4 = vld [vmem:[#allocation5 + $0x40] sm:$0xff] }
  0xf9   : > { %1562 = vmatpush.bf16.msra.mxu0 %v2708_v0 }
  0xfa   : > { %v990_v6 = vrot.slane %v982_v7, 7  ;;  %v1046_v9 = vpack.c.bf16 %v982_v7, %v981_v13  ;;  %v1014_v24 = vrot.slane %v982_v7, 1  ;;  %v2703_v13 = vld [vmem:[#allocation5 + $0x28] sm:$0xff] }
  0xfc   : > { %2367 = vmatmul.msk.bf16.gmra.mxu3 %vm1080_vm0, %v1046_v9  ;;  %v998_v25 = vsel %vm4007_vm7, %v990_v6, %v983_v5  ;;  %v1015_v27 = vsel %vm4008_vm14, %v1013_v57, %v1014_v24  ;;  %v1022_v28 = vsel %vm4009_vm12, %v1014_v24, %v1007_v22  ;;  %vm4010_vm14 = vmmov %vm4007_vm7  ;;  %vm4011_vm12 = vnez %v3974_v46  ;;  %v2704_v57 = vld [vmem:[#allocation5 + $0x30] sm:$0xff] }
  0xfd   : > { %v999_v8 = vsel %vm3190_vm4, 0.0, %v998_v25  ;;  %v1029_v29 = vsel %vm3318_vm6, 0.0, %v1015_v27  ;;  %v1030_v30 = vsel %vm3322_vm11, 0.0, %v1022_v28  ;;  %v995_v36 = vsel %vm4010_vm14, %v985_v34, %v986_v33  ;;  %vm4012_vm11 = vmmov %vm4007_vm7  ;;  %1419 = vmatpush.bf16.msrb.mxu2 %v2704_v57  ;;  %1563 = vmatpush.bf16.msra.mxu0 %v2707_v2  ;;  %v2700_v9 = vld [vmem:[#allocation5 + $0x10] sm:$0xff] }
  0xfe   : > { %v1031_v26 = vpack.c.bf16 %v1000_v32, %v999_v8  ;;  %v1190_v35 = vpack.c.bf16 %v1030_v30, %v1029_v29  ;;  %v1002_v22 = vsel %vm3231_vm8, 0.0, %v995_v36  ;;  %v1001_v39 = vsel %vm4011_vm12, 0.0, %v996_v31  ;;  %vm4013_vm14 = vmmov %vm4007_vm7  ;;  %1484 = vmatpush.bf16.msrb.mxu3 %v2700_v9  ;;  %v3519_v24 = vld [vmem:[%s3914_s5] ss:$0 sm:$0xff] }
  0xff   : > { %v1032_v40 = vpack.c.bf16 %v1002_v22, %v1001_v39  ;;  %v993_v44 = vsel %vm4012_vm11, %v987_v62, %v988_v45  ;;  %v994_v50 = vsel %vm4013_vm14, %v986_v33, %v987_v62  ;;  %vm4014_vm7 = vnez %v3984_v17  ;;  %vm4016_vm12 = vmmov %vm4012_vm11  ;;  %v3525_v27 = vld [vmem:[%s3915_s6] ss:$0 sm:$0xff] }
 0x100   : > { %2384 = vmatmul.msk.bf16.vlgmr.msrb.gmra.mxu0 %vm1080_vm0, %v1031_v26  ;;  %v1004_v51 = vsel %vm4014_vm7, 0.0, %v993_v44  ;;  %vm4015_vm8 = vnez %v3982_v16  ;;  %v991_v43 = vsel %vm4016_vm12, %v989_v54, %v990_v6  ;;  %vm4017_vm6 = vmmov %vm4012_vm11 }
 0x101   : > { %v1003_v52 = vsel %vm4015_vm8, 0.0, %v994_v50  ;;  %v992_v11 = vsel %vm4017_vm6, %v988_v45, %v989_v54  ;;  %v1006_v10 = vsel %vm3308_vm2, 0.0, %v991_v43  ;;  %1420 = vmatpush.bf16.msrb.mxu2 %v2703_v13  ;;  %1564 = vmatpush.bf16.msra.mxu0 %v2706_v4  ;;  %vm4018_vm6 = vcmp.lt.s32.totalorder %v3160_v1, 7 }
 0x102   : > { %v1033_v53 = vpack.c.bf16 %v1004_v51, %v1003_v52  ;;  %v1005_v18 = vsel %vm3304_vm15, 0.0, %v992_v11  ;;  %vm4019_vm11 = vmmov %vm4018_vm6 }
 0x103   : > { %v1034_v55 = vpack.c.bf16 %v1006_v10, %v1005_v18  ;;  %vm4020_vm12 = vmmov %vm4018_vm6 }
 0x104   : > { %vm4021_vm14 = vmmov %vm4018_vm6 }
 0x105   : > { %1421 = vmatpush.bf16.msrb.mxu2 %v2702_v59 }
 0x108   : > { %2415 = vmatmul.msk.bf16.gmra.mxu1 %vm1080_vm0, %v1190_v35 }
 0x110   : > { %2385 = vmatmul.msk.bf16.gmra.mxu0 %vm1080_vm0, %v1032_v40  ;;  %v2699_v40 = vld [vmem:[#allocation5 + $0x8] sm:$0xff] }
 0x111   : > { %1485 = vmatpush.bf16.msrb.mxu3 %v2699_v40 }
 0x120   : > { %2386 = vmatmul.msk.bf16.gmra.mxu0 %vm1080_vm0, %v1033_v53 }
 0x130   : > { %2387 = vmatmul.msk.bf16.gmra.mxu0 %vm1080_vm0, %v1034_v55 }
 0x14f   : > { %v1102_v60 = vpop.f32.mrf.mxu3 }
 0x155   : > { %v1245_v63 = vpop.f32.mrf.mxu1 }
 0x157   : > { %v1104_v3 = vpop.f32.mrf.mxu3 }
 0x15d   : > { %v1247_v5 = vpop.f32.mrf.mxu1 }
 0x15f   : > { %v1107_v25 = vpop.f32.mrf.mxu3 }
 0x165   : > { %v1250_v8 = vpop.f32.mrf.mxu1 }
 0x167   : > { %v1109_v35 = vpop.f32.mrf.mxu3 }
 0x16d   : > { %v1252_v45 = vpop.f32.mrf.mxu1 }
 0x16f   : > { %v1112_v10 = vpop.f32.mrf.mxu3 }
 0x175   : > { %v1255_v57 = vpop.f32.mrf.mxu1 }
 0x17d   : > { %v1167_v7 = vpop.f32.mrf.mxu0 }
 0x17e   : > { %v1168_v6 = vadd.f32 %v1167_v7, %v1102_v60  ;;  %v2698_v7 = vld [vmem:[#allocation5] sm:$0xff] }
 0x17f   : > { %1486 = vmatpush.bf16.msrb.mxu3 %v2698_v7 }
 0x180   : > { %v1265_v15 = vadd.f32 %v1245_v63, %v1168_v6  ;;  %v1114_v6 = vpop.f32.mrf.mxu3 }
 0x182   : > { %v1277_v26 = vmul.f32 %v3519_v24, %v1265_v15  ;;  %v1257_v15 = vpop.f32.mrf.mxu1 }
 0x184   : > { %v1289_v30 = vadd.f32 %v3525_v27, %v1277_v26 }
 0x185   : > { %v1169_v32 = vpop.f32.mrf.mxu0 }
 0x186   : > { %v1170_v28 = vadd.f32 %v1169_v32, %v1104_v3  ;;  %v3530_v31 = vmax.f32 %v1289_v30, 0.0 }
 0x188   : > { %v1266_v29 = vadd.f32 %v1247_v5, %v1170_v28  ;;  %v1329_v54 = vrot.slane %v3530_v31, 1 }
 0x18a   : > { %v1278_v33 = vmul.f32 %v3519_v24, %v1266_v29 }
 0x18c   : > { %v1290_v34 = vadd.f32 %v3525_v27, %v1278_v33 }
 0x18d   : > { %v1172_v36 = vpop.f32.mrf.mxu0 }
 0x18e   : > { %v3532_v22 = vmax.f32 %v1290_v34, 0.0  ;;  %v1173_v39 = vadd.f32 %v1172_v36, %v1107_v25  ;;  %v1117_v36 = vpop.f32.mrf.mxu3 }
 0x190   : > { %v1267_v62 = vadd.f32 %v1250_v8, %v1173_v39  ;;  %v1365_v44 = vpack.c.bf16 %v3532_v22, %v3530_v31  ;;  %v1330_v51 = vrot.slane %v3532_v22, 1  ;;  %v1306_v7 = vrot.slane %v3532_v22, 7 }
 0x192   : > { %v1279_v50 = vmul.f32 %v3519_v24, %v1267_v62  ;;  %2432 = vmatmul.msk.bf16.vlgmr.msrb.gmra.mxu2 %vm1080_vm0, %v1365_v44  ;;  %v1343_v56 = vsel %vm4018_vm6, %v1329_v54, %v1330_v51  ;;  %v1260_v44 = vpop.f32.mrf.mxu1 }
 0x193   : > { %v1345_v59 = vsel %vm3183_vm3, 0.0, %v1343_v56 }
 0x194   : > { %v1291_v52 = vadd.f32 %v3525_v27, %v1279_v50 }
 0x195   : > { %v1174_v53 = vpop.f32.mrf.mxu0 }
 0x196   : > { %v3541_v43 = vmax.f32 %v1291_v52, 0.0  ;;  %v1175_v11 = vadd.f32 %v1174_v53, %v1109_v35  ;;  %v1119_v56 = vpop.f32.mrf.mxu3 }
 0x198   : > { %v1331_v18 = vrot.slane %v3541_v43, 1  ;;  %v1268_v55 = vadd.f32 %v1252_v45, %v1175_v11 }
 0x19a   : > { %v1280_v13 = vmul.f32 %v3519_v24, %v1268_v55  ;;  %v1342_v58 = vsel %vm4019_vm11, %v1330_v51, %v1331_v18  ;;  %vm4022_vm11 = vmmov %vm4018_vm6 }
 0x19b   : > { %v1346_v60 = vsel %vm3195_vm5, 0.0, %v1342_v58 }
 0x19c   : > { %v1292_v61 = vadd.f32 %v3525_v27, %v1280_v13  ;;  %v1508_v63 = vpack.c.bf16 %v1346_v60, %v1345_v59  ;;  %v1262_v59 = vpop.f32.mrf.mxu1 }
 0x19d   : > { %v1177_v0 = vpop.f32.mrf.mxu0 }
 0x19e   : > { %v3556_v2 = vmax.f32 %v1292_v61, 0.0  ;;  %v1178_v3 = vadd.f32 %v1177_v0, %v1112_v10  ;;  %2472 = vmatmul.msk.bf16.vlgmr.msra.gmra.mxu0 %vm1080_vm0, %v1508_v63 }
 0x1a0   : > { %v1269_v4 = vadd.f32 %v1255_v57, %v1178_v3  ;;  %v1366_v5 = vpack.c.bf16 %v3556_v2, %v3541_v43  ;;  %v1332_v8 = vrot.slane %v3556_v2, 1 }
 0x1a2   : > { %v1281_v9 = vmul.f32 %v3519_v24, %v1269_v4  ;;  %2433 = vmatmul.msk.bf16.gmra.mxu2 %vm1080_vm0, %v1366_v5  ;;  %v1341_v33 = vsel %vm4020_vm12, %v1331_v18, %v1332_v8  ;;  %vm4023_vm12 = vnez %v3988_v20 }
 0x1a3   : > { %v1347_v39 = vsel %vm3235_vm9, 0.0, %v1341_v33 }
 0x1a4   : > { %v1293_v25 = vadd.f32 %v3525_v27, %v1281_v9 }
 0x1a5   : > { %v1179_v32 = vpop.f32.mrf.mxu0 }
 0x1a6   : > { %v3565_v26 = vmax.f32 %v1293_v25, 0.0  ;;  %v1180_v28 = vadd.f32 %v1179_v32, %v1114_v6 }
 0x1a8   : > { %v1270_v29 = vadd.f32 %v1257_v15, %v1180_v28  ;;  %v1333_v30 = vrot.slane %v3565_v26, 1  ;;  %v1305_v15 = vrot.slane %v3530_v31, 7 }
 0x1aa   : > { %v1282_v34 = vmul.f32 %v3519_v24, %v1270_v29  ;;  %v1340_v35 = vsel %vm4021_vm14, %v1332_v8, %v1333_v30  ;;  %vm4024_vm14 = vcmp.lt.s32.totalorder %v3160_v1, 1 }
 0x1ab   : > { %v1348_v40 = vsel %vm3239_vm10, 0.0, %v1340_v35  ;;  %v1319_v32 = vsel %vm4024_vm14, %v1305_v15, %v1306_v7 }
 0x1ac   : > { %v1294_v45 = vadd.f32 %v3525_v27, %v1282_v34  ;;  %v1509_v62 = vpack.c.bf16 %v1348_v40, %v1347_v39  ;;  %v1322_v22 = vsel %vm3175_vm1, 0.0, %v1319_v32  ;;  %v1308_v39 = vrot.slane %v3556_v2, 7 }
 0x1ad   : > { %v1182_v50 = vpop.f32.mrf.mxu0 }
 0x1ae   : > { %v3578_v51 = vmax.f32 %v1294_v45, 0.0  ;;  %v1183_v52 = vadd.f32 %v1182_v50, %v1117_v36  ;;  %2473 = vmatmul.msk.bf16.gmra.mxu0 %vm1080_vm0, %v1509_v62  ;;  %v1307_v45 = vrot.slane %v3541_v43, 7  ;;  %v1309_v43 = vrot.slane %v3565_v26, 7 }
 0x1b0   : > { %v1271_v53 = vadd.f32 %v1260_v44, %v1183_v52  ;;  %v1367_v11 = vpack.c.bf16 %v3578_v51, %v3565_v26  ;;  %v1334_v55 = vrot.slane %v3578_v51, 1  ;;  %v1310_v2 = vrot.slane %v3578_v51, 7 }
 0x1b2   : > { %v1283_v10 = vmul.f32 %v3519_v24, %v1271_v53  ;;  %2434 = vmatmul.msk.bf16.gmra.mxu2 %vm1080_vm0, %v1367_v11  ;;  %v1339_v63 = vsel %vm4018_vm6, %v1333_v30, %v1334_v55  ;;  %vm4025_vm6 = vmmov %vm4024_vm14 }
 0x1b3   : > { %v1349_v4 = vsel %vm3282_vm13, 0.0, %v1339_v63  ;;  %vm4026_vm14 = vmmov %vm4022_vm11  ;;  %vm4028_vm13 = vnez %v3996_v42  ;;  %v2722_v63 = vld [vmem:[%s3919_s10 + $0x60] sm:$0xff] }
 0x1b4   : > { %v1295_v18 = vadd.f32 %v3525_v27, %v1283_v10 }
 0x1b5   : > { %v1184_v57 = vpop.f32.mrf.mxu0 }
 0x1b6   : > { %v1303_v13 = vmax.f32 %v1295_v18, 0.0  ;;  %v1185_v58 = vadd.f32 %v1184_v57, %v1119_v56 }
 0x1b8   : > { %v1272_v60 = vadd.f32 %v1262_v59, %v1185_v58  ;;  %v1335_v61 = vrot.slane %v1303_v13, 1  ;;  %v2725_v59 = vld [vmem:[%s3919_s10 + $0x78] sm:$0xff] }
 0x1b9   : > { %1763 = vmatpush.bf16.msra.mxu1 %v2725_v59 }
 0x1ba   : > { %v1284_v0 = vmul.f32 %v3519_v24, %v1272_v60  ;;  %v1338_v3 = vsel %vm4022_vm11, %v1334_v55, %v1335_v61  ;;  %v1311_v55 = vrot.slane %v1303_v13, 7  ;;  %v2723_v60 = vld [vmem:[%s3919_s10 + $0x68] sm:$0xff] }
 0x1bb   : > { %v1350_v5 = vsel %vm4023_vm12, 0.0, %v1338_v3  ;;  %v2721_v3 = vld [vmem:[%s3919_s10 + $0x58] sm:$0xff] }
 0x1bc   : > { %v1296_v6 = vadd.f32 %v3525_v27, %v1284_v0  ;;  %v1510_v9 = vpack.c.bf16 %v1350_v5, %v1349_v4  ;;  %v2732_v0 = vld [vmem:[%s3919_s10 + $0xb0] sm:$0xff]  ;;  %v2731_v4 = vld [vmem:[%s3919_s10 + $0xa8] sm:$0xff] }
 0x1bd   : > { %v2720_v5 = vld [vmem:[%s3919_s10 + $0x50] sm:$0xff] }
 0x1be   : > { %v1304_v25 = vmax.f32 %v1296_v6, 0.0  ;;  %2474 = vmatmul.msk.bf16.gmra.mxu0 %vm1080_vm0, %v1510_v9  ;;  %v2719_v6 = vld [vmem:[%s3919_s10 + $0x48] sm:$0xff]  ;;  %v2729_v9 = vld [vmem:[%s3919_s10 + $0x98] sm:$0xff] }
 0x1c0   : > { %v1312_v24 = vrot.slane %v1304_v25, 7  ;;  %v1368_v8 = vpack.c.bf16 %v1304_v25, %v1303_v13  ;;  %v1336_v29 = vrot.slane %v1304_v25, 1  ;;  %v2724_v13 = vld [vmem:[%s3919_s10 + $0x70] sm:$0xff] }
 0x1c1   : > { %1764 = vmatpush.bf16.msra.mxu1 %v2724_v13 }
 0x1c2   : > { %2435 = vmatmul.msk.bf16.gmra.mxu2 %vm1080_vm0, %v1368_v8  ;;  %v1320_v28 = vsel %vm4025_vm6, %v1312_v24, %v1305_v15  ;;  %v1337_v33 = vsel %vm4022_vm11, %v1335_v61, %v1336_v29  ;;  %v1344_v34 = vsel %vm4026_vm14, %v1336_v29, %v1329_v54  ;;  %vm4027_vm6 = vnez %v3994_v41  ;;  %v2733_v61 = vld [vmem:[%s3919_s10 + $0xb8] sm:$0xff]  ;;  %v2718_v15 = vld [vmem:[%s3919_s10 + $0x40] sm:$0xff]  ;;  %v2728_v8 = vld [vmem:[%s3919_s10 + $0x90] sm:$0xff] }
 0x1c3   : > { %v1321_v27 = vsel %vm3190_vm4, 0.0, %v1320_v28  ;;  %v1351_v35 = vsel %vm4027_vm6, 0.0, %v1337_v33  ;;  %v1352_v36 = vsel %vm4028_vm13, 0.0, %v1344_v34  ;;  %vm4029_vm11 = vcmp.lt.s32.totalorder %v3160_v1, 1  ;;  %1938 = vmatpush.bf16.msra.mxu3 %v2733_v61  ;;  %v2727_v28 = vld [vmem:[%s3919_s10 + $0x88] sm:$0xff]  ;;  %v2716_v29 = vld [vmem:[%s3919_s10 + $0x30] sm:$0xff] }
 0x1c4   : > { %v1353_v30 = vpack.c.bf16 %v1322_v22, %v1321_v27  ;;  %v1511_v40 = vpack.c.bf16 %v1352_v36, %v1351_v35  ;;  %v1317_v62 = vsel %vm4029_vm11, %v1307_v45, %v1308_v39  ;;  %vm4030_vm4 = vmmov %vm4029_vm11  ;;  %vm4031_vm14 = vnez %v3976_v47  ;;  %v2726_v27 = vld [vmem:[%s3919_s10 + $0x80] sm:$0xff] }
 0x1c5   : > { %v1318_v31 = vsel %vm4030_vm4, %v1306_v7, %v1307_v45  ;;  %v1324_v54 = vsel %vm4031_vm14, 0.0, %v1317_v62  ;;  %vm4032_vm6 = vnez %v3974_v46  ;;  %vm4033_vm13 = vmmov %vm4030_vm4  ;;  %v1313_v51 = vsel %vm4030_vm4, %v1311_v55, %v1312_v24  ;;  %1765 = vmatpush.bf16.msra.mxu1 %v2723_v60  ;;  %v2730_v7 = vld [vmem:[%s3919_s10 + $0xa0] sm:$0xff]  ;;  %v2717_v24 = vld [vmem:[%s3919_s10 + $0x38] sm:$0xff] }
 0x1c6   : > { %2452 = vmatmul.msk.bf16.vlgmr.msrb.gmra.mxu3 %vm1080_vm0, %v1353_v30  ;;  %v1323_v44 = vsel %vm4032_vm6, 0.0, %v1318_v31  ;;  %v1315_v52 = vsel %vm4033_vm13, %v1309_v43, %v1310_v2  ;;  %vm4034_vm11 = vmmov %vm4030_vm4  ;;  %v1328_v56 = vsel %vm3308_vm2, 0.0, %v1313_v51  ;;  %1840 = vmatpush.bf16.msra.mxu2 %v2717_v24  ;;  %v2715_v30 = vld [vmem:[%s3919_s10 + $0x28] sm:$0xff] }
 0x1c7   : > { %v1354_v50 = vpack.c.bf16 %v1324_v54, %v1323_v44  ;;  %v1316_v53 = vsel %vm4034_vm11, %v1308_v39, %v1309_v43  ;;  %v1326_v11 = vsel %vm4014_vm7, 0.0, %v1315_v52  ;;  %vm4035_vm6 = vmmov %vm4030_vm4  ;;  %1939 = vmatpush.bf16.msra.mxu3 %v2732_v0  ;;  %v3712_v39 = vld [vmem:[%s3917_s8] ss:$0 sm:$0xff] }
 0x1c8   : > { %v1325_v10 = vsel %vm4015_vm8, 0.0, %v1316_v53  ;;  %v1314_v26 = vsel %vm4035_vm6, %v1310_v2, %v1311_v55  ;;  %v3718_v54 = vld [vmem:[%s3918_s9] ss:$0 sm:$0xff]  ;;  %v2713_v53 = vld [vmem:[%s3919_s10 + $0x18] sm:$0xff]  ;;  %vm2624_vm13 = vmneg %vm3195_vm5  ;;  %vm4036_vm6 = vcmp.lt.s32.totalorder %v3160_v1, 7 }
 0x1c9   : > { %v1355_v18 = vpack.c.bf16 %v1326_v11, %v1325_v10  ;;  %v1327_v57 = vsel %vm3304_vm15, 0.0, %v1314_v26  ;;  %1766 = vmatpush.bf16.msra.mxu1 %v2722_v63  ;;  %vm4037_vm5 = vmmov %vm4036_vm6 }
 0x1ca   : > { %v1356_v58 = vpack.c.bf16 %v1328_v56, %v1327_v57  ;;  %1841 = vmatpush.bf16.msra.mxu2 %v2716_v29  ;;  %vm2630_vm4 = vmneg %vm3235_vm9 }
 0x1cb   : > { %1940 = vmatpush.bf16.msra.mxu3 %v2731_v4  ;;  %vm2634_vm9 = vmneg %vm4023_vm12 }
 0x1cc   : > { %vm2556_vm12 = vmneg %vm3175_vm1  ;;  %vm4046_vm1 = vnez %v3996_v42 }
 0x1cd   : > { %1767 = vmatpush.bf16.msra.mxu1 %v2721_v3  ;;  %v2712_v3 = vld [vmem:[%s3919_s10 + $0x10] sm:$0xff] }
 0x1ce   : > { %2475 = vmatmul.msk.bf16.gmra.mxu0 %vm1080_vm0, %v1511_v40  ;;  %1842 = vmatpush.bf16.msra.mxu2 %v2715_v30 }
 0x1cf   : > { %1941 = vmatpush.bf16.msra.mxu3 %v2730_v7 }
 0x1d1   : > { %1768 = vmatpush.bf16.msra.mxu1 %v2720_v5 }
 0x1d3   : > { %1942 = vmatpush.bf16.msra.mxu3 %v2729_v9 }
 0x1d5   : > { %1769 = vmatpush.bf16.msra.mxu1 %v2719_v6 }
 0x1d6   : > { %2453 = vmatmul.msk.bf16.gmra.mxu3 %vm1080_vm0, %v1354_v50  ;;  %v2714_v50 = vld [vmem:[%s3919_s10 + $0x20] sm:$0xff] }
 0x1d7   : > { %1943 = vmatpush.bf16.msra.mxu3 %v2728_v8  ;;  %1843 = vmatpush.bf16.msra.mxu2 %v2714_v50 }
 0x1d9   : > { %1770 = vmatpush.bf16.msra.mxu1 %v2718_v15 }
 0x1db   : > { %1944 = vmatpush.bf16.msra.mxu3 %v2727_v28  ;;  %1844 = vmatpush.bf16.msra.mxu2 %v2713_v53 }
 0x1df   : > { %1945 = vmatpush.bf16.msra.mxu3 %v2726_v27  ;;  %1845 = vmatpush.bf16.msra.mxu2 %v2712_v3 }
 0x1e3   : > { %1846 = vmatpush.bf16.msra.mxu2 %v2711_v14 }
 0x1e6   : > { %2454 = vmatmul.msk.bf16.gmra.mxu3 %vm1080_vm0, %v1355_v18 }
 0x1f6   : > { %2455 = vmatmul.msk.bf16.gmra.mxu3 %vm1080_vm0, %v1356_v58  ;;  %vm2625_vm0 = vmneg %vm3183_vm3 }
 0x1f7   : > { %vm2626_vm11 = vmpackc.low %vm2624_vm13, %vm2625_vm0 }
 0x1f8   : > { %vm2629_vm3 = vmneg %vm3239_vm10  ;;  %vm4040_vm10 = vnez %v3986_v19 }
 0x1f9   : > { %vm4038_vm13 = vmmov %vm4037_vm5 }
 0x1fa   : > { %vm4039_vm0 = vmmov %vm4037_vm5 }
 0x215   : > { %v1423_v25 = vpop.f32.mrf.mxu2 }
 0x21b   : > { %v1566_v32 = vpop.f32.mrf.mxu0 }
 0x21d   : > { %v1425_v22 = vpop.f32.mrf.mxu2 }
 0x223   : > { %v1568_v33 = vpop.f32.mrf.mxu0 }
 0x225   : > { %v1428_v40 = vpop.f32.mrf.mxu2 }
 0x22b   : > { %v1571_v45 = vpop.f32.mrf.mxu0 }
 0x22d   : > { %v1430_v10 = vpop.f32.mrf.mxu2 }
 0x233   : > { %v1573_v56 = vpop.f32.mrf.mxu0 }
 0x235   : > { %v1433_v4 = vpop.f32.mrf.mxu2 }
 0x23b   : > { %v1576_v9 = vpop.f32.mrf.mxu0 }
 0x249   : > { %v1488_v34 = vpop.f32.mrf.mxu3 }
 0x24a   : > { %v1489_v35 = vadd.f32 %v1488_v34, %v1423_v25 }
 0x24c   : > { %v1586_v36 = vadd.f32 %v1566_v32, %v1489_v35  ;;  %v2710_v32 = vld [vmem:[%s3919_s10] sm:$0xff]  ;;  %v1578_v35 = vpop.f32.mrf.mxu0 }
 0x24d   : > { %1847 = vmatpush.bf16.msra.mxu2 %v2710_v32 }
 0x24e   : > { %v1598_v31 = vmul.f32 %v3712_v39, %v1586_v36 }
 0x250   : > { %v1610_v43 = vadd.f32 %v3718_v54, %v1598_v31 }
 0x251   : > { %v1490_v62 = vpop.f32.mrf.mxu3 }
 0x252   : > { %v1491_v44 = vadd.f32 %v1490_v62, %v1425_v22  ;;  %v3729_v55 = vmax.f32 %v1610_v43, 0.0 }
 0x254   : > { %v1587_v2 = vadd.f32 %v1568_v33, %v1491_v44  ;;  %v1650_v5 = vrot.slane %v3729_v55, 1  ;;  %v1435_v33 = vpop.f32.mrf.mxu2  ;;  %v1626_v19 = vrot.slane %v3729_v55, 7 }
 0x256   : > { %v1599_v52 = vmul.f32 %v3712_v39, %v1587_v2 }
 0x258   : > { %v1611_v11 = vadd.f32 %v3718_v54, %v1599_v52 }
 0x259   : > { %v1493_v18 = vpop.f32.mrf.mxu3 }
 0x25a   : > { %v3731_v51 = vmax.f32 %v1611_v11, 0.0  ;;  %v1494_v26 = vadd.f32 %v1493_v18, %v1428_v40 }
 0x25c   : > { %v1588_v57 = vadd.f32 %v1571_v45, %v1494_v26  ;;  %v1694_v58 = vpack.c.bf16 %v3731_v51, %v3729_v55  ;;  %v1651_v61 = vrot.slane %v3731_v51, 1  ;;  %v1438_v53 = vpop.f32.mrf.mxu2  ;;  %v1627_v20 = vrot.slane %v3731_v51, 7 }
 0x25e   : > { %v1600_v59 = vmul.f32 %v3712_v39, %v1588_v57  ;;  %1771 = vmatmul.bf16.vlgmr.msra.gmra.mxu1 %v1694_v58  ;;  %v1664_v25 = vsel %vm4037_vm5, %v1650_v5, %v1651_v61  ;;  %vm2635_vm5 = vmneg %vm4040_vm10 }
 0x260   : > { %v1612_v13 = vadd.f32 %v3718_v54, %v1600_v59 }
 0x261   : > { %v1495_v60 = vpop.f32.mrf.mxu3 }
 0x262   : > { %v3738_v63 = vmax.f32 %v1612_v13, 0.0  ;;  %v1496_v0 = vadd.f32 %v1495_v60, %v1430_v10  ;;  %v1581_v10 = vpop.f32.mrf.mxu0 }
 0x264   : > { %v1652_v7 = vrot.slane %v3738_v63, 1  ;;  %v1589_v6 = vadd.f32 %v1573_v56, %v1496_v0  ;;  %v1440_v13 = vpop.f32.mrf.mxu2 }
 0x266   : > { %v1601_v15 = vmul.f32 %v3712_v39, %v1589_v6  ;;  %v1663_v23 = vsel %vm4036_vm6, %v1651_v61, %v1652_v7  ;;  %vm2631_vm6 = vmpackc.low %vm2629_vm3, %vm2630_vm4 }
 0x267   : > { %v2627_v24 = vpack.c.bf16 %v1663_v23, %v1664_v25  ;;  %vm4042_vm3 = vmmov %vm4039_vm0 }
 0x268   : > { %v1613_v8 = vadd.f32 %v3718_v54, %v1601_v15  ;;  %vm2636_vm4 = vmpackc.low %vm2634_vm9, %vm2635_vm5 }
 0x269   : > { %v1498_v28 = vpop.f32.mrf.mxu3  ;;  %2628 = vmatmul.msk.bf16.vlgmr.msra.gmra.mxu3 %vm2626_vm11, %v2627_v24  ;;  %vm4041_vm11 = vmmov %vm4039_vm0 }
 0x26a   : > { %v1499_v29 = vadd.f32 %v1498_v28, %v1433_v4  ;;  %v3763_v27 = vmax.f32 %v1613_v8, 0.0  ;;  %v1583_v4 = vpop.f32.mrf.mxu0  ;;  %vm2639_vm5 = vmneg %vm4046_vm1 }
 0x26c   : > { %v1590_v22 = vadd.f32 %v1576_v9, %v1499_v29  ;;  %v1695_v30 = vpack.c.bf16 %v3763_v27, %v3738_v63  ;;  %v1653_v31 = vrot.slane %v3763_v27, 1 }
 0x26e   : > { %v1602_v34 = vmul.f32 %v3712_v39, %v1590_v22  ;;  %1776 = vmatmul.bf16.gmra.mxu1 %v1695_v30  ;;  %v1662_v52 = vsel %vm4039_vm0, %v1652_v7, %v1653_v31  ;;  %v1629_v22 = vrot.slane %v3763_v27, 7  ;;  %v1628_v30 = vrot.slane %v3738_v63, 7 }
 0x270   : > { %v1614_v36 = vadd.f32 %v3718_v54, %v1602_v34 }
 0x271   : > { %v1500_v40 = vpop.f32.mrf.mxu3 }
 0x272   : > { %v3769_v45 = vmax.f32 %v1614_v36, 0.0  ;;  %v1501_v62 = vadd.f32 %v1500_v40, %v1435_v33 }
 0x274   : > { %v1591_v44 = vadd.f32 %v1578_v35, %v1501_v62  ;;  %v1654_v50 = vrot.slane %v3769_v45, 1  ;;  %v1630_v27 = vrot.slane %v3769_v45, 7 }
 0x276   : > { %v1603_v2 = vmul.f32 %v3712_v39, %v1591_v44  ;;  %v1661_v43 = vsel %vm4038_vm13, %v1653_v31, %v1654_v50  ;;  %vm4043_vm13 = vnez %v3970_v21 }
 0x277   : > { %v2632_v11 = vpack.c.bf16 %v1661_v43, %v1662_v52  ;;  %vm2557_vm0 = vmneg %vm4043_vm13  ;;  %v2741_v43 = vld [vmem:[#allocation7 + $0x38] sm:$0xff] }
 0x278   : > { %v1615_v49 = vadd.f32 %v3718_v54, %v1603_v2  ;;  %vm2558_vm10 = vmpackc.low %vm2556_vm12, %vm2557_vm0  ;;  %vm4050_vm0 = vnez %v3974_v46  ;;  %2171 = vmatpush.bf16.msrb.mxu0 %v2741_v43 }
 0x279   : > { %v1503_v18 = vpop.f32.mrf.mxu3  ;;  %2633 = vmatmul.msk.bf16.gmra.mxu3 %vm2631_vm6, %v2632_v11  ;;  %vm4044_vm6 = vcmp.lt.s32.totalorder %v3160_v1, 1  ;;  %vm2561_vm12 = vmneg %vm4031_vm14 }
 0x27a   : > { %v1504_v48 = vadd.f32 %v1503_v18, %v1438_v53  ;;  %v3783_v26 = vmax.f32 %v1615_v49, 0.0  ;;  %v1640_v32 = vsel %vm4044_vm6, %v1626_v19, %v1627_v20  ;;  %vm4045_vm9 = vmmov %vm4044_vm6 }
 0x27b   : > { %vm2567_vm14 = vmneg %vm4015_vm8 }
 0x27c   : > { %v1592_v56 = vadd.f32 %v1581_v10, %v1504_v48  ;;  %v1696_v57 = vpack.c.bf16 %v3783_v26, %v3769_v45  ;;  %v1655_v3 = vrot.slane %v3783_v26, 1  ;;  %v2740_v48 = vld [vmem:[#allocation7 + $0x30] sm:$0xff] }
 0x27d   : > { %2172 = vmatpush.bf16.msrb.mxu0 %v2740_v48 }
 0x27e   : > { %v1604_v58 = vmul.f32 %v3712_v39, %v1592_v56  ;;  %1781 = vmatmul.bf16.gmra.mxu1 %v1696_v57  ;;  %v1660_v23 = vsel %vm4042_vm3, %v1654_v50, %v1655_v3 }
 0x280   : > { %v1616_v59 = vadd.f32 %v3718_v54, %v1604_v58  ;;  %v3851_v58 = vld [vmem:[%s3920_s11] ss:$0 sm:$0xff] }
 0x281   : > { %v1505_v60 = vpop.f32.mrf.mxu3 }
 0x282   : > { %v1624_v61 = vmax.f32 %v1616_v59, 0.0  ;;  %v1506_v0 = vadd.f32 %v1505_v60, %v1440_v13  ;;  %v2739_v60 = vld [vmem:[#allocation7 + $0x28] sm:$0xff] }
 0x283   : > { %2173 = vmatpush.bf16.msrb.mxu0 %v2739_v60 }
 0x284   : > { %v1593_v7 = vadd.f32 %v1583_v4, %v1506_v0  ;;  %v1656_v6 = vrot.slane %v1624_v61, 1  ;;  %v1632_v33 = vrot.slane %v1624_v61, 7  ;;  %v3859_v4 = vld [vmem:[%s3921_s12] ss:$0 sm:$0xff] }
 0x286   : > { %v1605_v9 = vmul.f32 %v3712_v39, %v1593_v7  ;;  %v1659_v15 = vsel %vm4041_vm11, %v1655_v3, %v1656_v6  ;;  %vm4047_vm11 = vnez %v3994_v41 }
 0x287   : > { %v2637_v25 = vpack.c.bf16 %v1659_v15, %v1660_v23  ;;  %vm2640_vm3 = vmneg %vm4047_vm11  ;;  %v2738_v23 = vld [vmem:[#allocation7 + $0x20] sm:$0xff] }
 0x288   : > { %v1617_v14 = vadd.f32 %v3718_v54, %v1605_v9  ;;  %vm2641_vm6 = vmpackc.low %vm2639_vm5, %vm2640_vm3  ;;  %2174 = vmatpush.bf16.msrb.mxu0 %v2738_v23 }
 0x289   : > { %2638 = vmatmul.msk.bf16.gmra.mxu3 %vm2636_vm4, %v2637_v25  ;;  %vm4048_vm4 = vcmp.lt.s32.totalorder %v3160_v1, 7  ;;  %vm2566_vm5 = vmneg %vm4014_vm7 }
 0x28a   : > { %v1625_v24 = vmax.f32 %v1617_v14, 0.0  ;;  %vm4049_vm13 = vmmov %vm4048_vm4 }
 0x28c   : > { %v1633_v39 = vrot.slane %v1625_v24, 7  ;;  %v1697_v8 = vpack.c.bf16 %v1625_v24, %v1624_v61  ;;  %v1657_v28 = vrot.slane %v1625_v24, 1 }
 0x28e   : > { %1786 = vmatmul.bf16.gmra.mxu1 %v1697_v8  ;;  %v1641_v54 = vsel %vm4045_vm9, %v1633_v39, %v1626_v19  ;;  %v1658_v12 = vsel %vm4048_vm4, %v1656_v6, %v1657_v28  ;;  %v1665_v21 = vsel %vm4049_vm13, %v1657_v28, %v1650_v5  ;;  %vm2562_vm9 = vmneg %vm4050_vm0  ;;  %v1631_v5 = vrot.slane %v3783_v26, 7 }
 0x28f   : > { %v2559_v51 = vpack.c.bf16 %v1640_v32, %v1641_v54  ;;  %v2642_v29 = vpack.c.bf16 %v1665_v21, %v1658_v12  ;;  %vm2563_vm11 = vmpackc.low %vm2561_vm12, %vm2562_vm9  ;;  %v2737_v54 = vld [vmem:[#allocation7 + $0x18] sm:$0xff]  ;;  %vm2111_vm9 = vcmask 1043459  }
 0x290   : > { %vm2568_vm13 = vmpackc.low %vm2566_vm5, %vm2567_vm14  ;;  %2175 = vmatpush.bf16.msrb.mxu0 %v2737_v54  ;;  %vm2119_vm5 = vcmask 1047559  }
 0x291   : > { %2560 = vmatmul.msk.bf16.vlgmr.msra.gmra.mxu2 %vm2558_vm10, %v2559_v51  ;;  %vm4051_vm10 = vcmp.lt.s32.totalorder %v3160_v1, 1  ;;  %vm2572_vm12 = vmneg %vm3304_vm15  ;;  %vm2109_vm15 = vcmask 1042434  }
 0x292   : > { %v1638_v41 = vsel %vm4051_vm10, %v1628_v30, %v1629_v22  ;;  %vm4052_vm1 = vmmov %vm4051_vm10  ;;  %vm2113_vm10 = vcmask 1044484  }
 0x293   : > { %v1639_v42 = vsel %vm4052_vm1, %v1627_v20, %v1628_v30  ;;  %vm4053_vm3 = vmmov %vm4052_vm1 }
 0x294   : > { %v2564_v55 = vpack.c.bf16 %v1638_v41, %v1639_v42  ;;  %v1636_v46 = vsel %vm4053_vm3, %v1630_v27, %v1631_v5  ;;  %vm4054_vm4 = vmmov %vm4052_vm1  ;;  %v2736_v42 = vld [vmem:[#allocation7 + $0x10] sm:$0xff] }
 0x295   : > { %v1637_v47 = vsel %vm4054_vm4, %v1629_v22, %v1630_v27  ;;  %vm4055_vm7 = vmmov %vm4052_vm1  ;;  %2176 = vmatpush.bf16.msrb.mxu0 %v2736_v42 }
 0x296   : > { %v2569_v63 = vpack.c.bf16 %v1636_v46, %v1637_v47  ;;  %v1634_v16 = vsel %vm4055_vm7, %v1632_v33, %v1633_v39  ;;  %vm4056_vm8 = vmmov %vm4052_vm1  ;;  %vm2115_vm1 = vcmask 1045509  }
 0x297   : > { %v1635_v17 = vsel %vm4056_vm8, %v1631_v5, %v1632_v33 }
 0x298   : > { %v2574_v34 = vpack.c.bf16 %v1634_v16, %v1635_v17  ;;  %v2735_v17 = vld [vmem:[#allocation7 + $0x8] sm:$0xff] }
 0x299   : > { %2643 = vmatmul.msk.bf16.gmra.mxu3 %vm2641_vm6, %v2642_v29  ;;  %vm2571_vm6 = vmneg %vm3308_vm2  ;;  %2177 = vmatpush.bf16.msrb.mxu0 %v2735_v17  ;;  %vm2107_vm2 = vcmask 1041409  }
 0x29a   : > { %vm2573_vm0 = vmpackc.low %vm2571_vm6, %vm2572_vm12 }
 0x2a1   : > { %2565 = vmatmul.msk.bf16.gmra.mxu2 %vm2563_vm11, %v2564_v55  ;;  %vm2117_vm11 = vcmask 1046534  }
 0x2b1   : > { %2570 = vmatmul.msk.bf16.gmra.mxu2 %vm2568_vm13, %v2569_v63 }
 0x2c1   : > { %2575 = vmatmul.msk.bf16.gmra.mxu2 %vm2573_vm0, %v2574_v34 }
 0x2db   : > { %v1772_v35 = vpop.f32.mrf.mxu1 }
 0x2e3   : > { %v1774_v40 = vpop.f32.mrf.mxu1 }
 0x2eb   : > { %v1777_v31 = vpop.f32.mrf.mxu1 }
 0x2ec   : > { %v1947_v36 = vpop.f32.mrf.mxu3 }
 0x2f3   : > { %v1779_v50 = vpop.f32.mrf.mxu1 }
 0x2f4   : > { %v1949_v45 = vpop.f32.mrf.mxu3 }
 0x2fb   : > { %v1782_v10 = vpop.f32.mrf.mxu1 }
 0x2fc   : > { %v1952_v38 = vpop.f32.mrf.mxu3 }
 0x303   : > { %v1784_v25 = vpop.f32.mrf.mxu1 }
 0x304   : > { %v1954_v2 = vpop.f32.mrf.mxu3 }
 0x30b   : > { %v1787_v47 = vpop.f32.mrf.mxu1 }
 0x30c   : > { %v1957_v26 = vpop.f32.mrf.mxu3 }
 0x314   : > { %v1849_v62 = vpop.f32.mrf.mxu2  ;;  %v1959_v39 = vpop.f32.mrf.mxu3 }
 0x315   : > { %v1850_v11 = vadd.f32 %v1849_v62, %v1772_v35 }
 0x317   : > { %v1967_v57 = vadd.f32 %v1947_v36, %v1850_v11 }
 0x319   : > { %v1979_v3 = vmul.f32 %v3851_v58, %v1967_v57 }
 0x31b   : > { %v1991_v20 = vadd.f32 %v3859_v4, %v1979_v3 }
 0x31c   : > { %v1851_v44 = vpop.f32.mrf.mxu2  ;;  %v1962_v34 = vpop.f32.mrf.mxu3 }
 0x31d   : > { %v1852_v52 = vadd.f32 %v1851_v44, %v1774_v40  ;;  %v1999_v12 = vmax.f32 %v1991_v20, 0.0 }
 0x31f   : > { %v1968_v18 = vadd.f32 %v1949_v45, %v1852_v52  ;;  %v2007_v5 = vrot.slane %v1999_v12, 4 }
 0x321   : > { %v1980_v13 = vmul.f32 %v3851_v58, %v1968_v18  ;;  %v2008_v40 = vadd.f32 %v2007_v5, %v1999_v12 }
 0x323   : > { %v1992_v9 = vadd.f32 %v3859_v4, %v1980_v13  ;;  %v2009_v52 = vrot.slane %v2008_v40, 2 }
 0x324   : > { %v1854_v37 = vpop.f32.mrf.mxu2 }
 0x325   : > { %v1855_v53 = vadd.f32 %v1854_v37, %v1777_v31  ;;  %v2000_v8 = vmax.f32 %v1992_v9, 0.0 }
 0x327   : > { %v1969_v56 = vadd.f32 %v1952_v38, %v1855_v53  ;;  %v2013_v30 = vrot.slane %v2000_v8, 4 }
 0x329   : > { %v1981_v61 = vmul.f32 %v3851_v58, %v1969_v56  ;;  %v2014_v33 = vadd.f32 %v2013_v30, %v2000_v8 }
 0x32b   : > { %v1993_v14 = vadd.f32 %v3859_v4, %v1981_v61  ;;  %v2015_v44 = vrot.slane %v2014_v33, 2 }
 0x32c   : > { %v1856_v1 = vpop.f32.mrf.mxu2 }
 0x32d   : > { %v1857_v49 = vadd.f32 %v1856_v1, %v1779_v50  ;;  %v2001_v51 = vmax.f32 %v1993_v14, 0.0 }
 0x32f   : > { %v1970_v59 = vadd.f32 %v1954_v2, %v1857_v49  ;;  %v2019_v55 = vrot.slane %v2001_v51, 4  ;;  %v2734_v2 = vld [vmem:[#allocation7] sm:$0xff] }
 0x330   : > { %2178 = vmatpush.bf16.msrb.mxu0 %v2734_v2 }
 0x331   : > { %v1982_v7 = vmul.f32 %v3851_v58, %v1970_v59  ;;  %v2020_v35 = vadd.f32 %v2019_v55, %v2001_v51  ;;  %v2010_v59 = vadd.f32 %v2009_v52, %v2008_v40 }
 0x333   : > { %v1994_v24 = vadd.f32 %v3859_v4, %v1982_v7  ;;  %v2021_v43 = vrot.slane %v2020_v35, 2 }
 0x334   : > { %v1859_v0 = vpop.f32.mrf.mxu2 }
 0x335   : > { %v1860_v6 = vadd.f32 %v1859_v0, %v1782_v10  ;;  %v2002_v21 = vmax.f32 %v1994_v24, 0.0  ;;  %v2016_v10 = vadd.f32 %v2015_v44, %v2014_v33  ;;  %v2022_v56 = vadd.f32 %v2021_v43, %v2020_v35  ;;  %v1964_v0 = vpop.f32.mrf.mxu3 }
 0x337   : > { %v1971_v15 = vadd.f32 %v1957_v26, %v1860_v6  ;;  %v2025_v27 = vrot.slane %v2002_v21, 4  ;;  %v1789_v26 = vpop.f32.mrf.mxu1  ;;  %v2017_v7 = vrot.slane %v2016_v10, 1  ;;  %v2023_v23 = vrot.slane %v2022_v56, 1 }
 0x339   : > { %v1983_v19 = vmul.f32 %v3851_v58, %v1971_v15  ;;  %v2026_v45 = vadd.f32 %v2025_v27, %v2002_v21  ;;  %v2024_v51 = vadd.f32 %v2023_v23, %v2022_v56 }
 0x33b   : > { %v1995_v32 = vadd.f32 %v3859_v4, %v1983_v19  ;;  %v2027_v53 = vrot.slane %v2026_v45, 2  ;;  %v2057_v5 = vmul.f32 0.125, %v2024_v51 }
 0x33c   : > { %v1861_v28 = vpop.f32.mrf.mxu2 }
 0x33d   : > { %v1862_v29 = vadd.f32 %v1861_v28, %v1784_v25  ;;  %v2003_v22 = vmax.f32 %v1995_v32, 0.0  ;;  %v2028_v13 = vadd.f32 %v2027_v53, %v2026_v45  ;;  %v2011_v25 = vrot.slane %v2010_v59, 1 }
 0x33f   : > { %v1972_v41 = vadd.f32 %v1959_v39, %v1862_v29  ;;  %v2031_v63 = vrot.slane %v2003_v22, 4  ;;  %v2029_v14 = vrot.slane %v2028_v13, 1  ;;  %v2018_v39 = vadd.f32 %v2017_v7, %v2016_v10 }
 0x340   : > { %v2012_v28 = vadd.f32 %v2011_v25, %v2010_v59 }
 0x341   : > { %v1984_v46 = vmul.f32 %v3851_v58, %v1972_v41  ;;  %v2032_v38 = vadd.f32 %v2031_v63, %v2003_v22  ;;  %v2030_v12 = vadd.f32 %v2029_v14, %v2028_v13  ;;  %v2056_v30 = vmul.f32 0.125, %v2018_v39 }
 0x342   : > { %v2055_v27 = vmul.f32 0.125, %v2012_v28 }
 0x343   : > { %v1996_v16 = vadd.f32 %v3859_v4, %v1984_v46  ;;  %v2033_v49 = vrot.slane %v2032_v38, 2  ;;  %v2058_v46 = vmul.f32 0.125, %v2030_v12  ;;  %v2064_v33 = vpack.c.bf16 %v2056_v30, %v2056_v30 }
 0x344   : > { %v1864_v36 = vpop.f32.mrf.mxu2  ;;  %v2063_v35 = vpack.c.bf16 %v2055_v27, %v2055_v27 }
 0x345   : > { %v2004_v62 = vmax.f32 %v1996_v16, 0.0  ;;  %v1865_v31 = vadd.f32 %v1864_v36, %v1787_v47  ;;  %v2034_v3 = vadd.f32 %v2033_v49, %v2032_v38  ;;  %v2066_v36 = vpack.c.bf16 %v2058_v46, %v2058_v46 }
 0x347   : > { %v2037_v50 = vrot.slane %v2004_v62, 4  ;;  %v1973_v37 = vadd.f32 %v1962_v34, %v1865_v31  ;;  %v2035_v19 = vrot.slane %v2034_v3, 1  ;;  %v2102_v2 = vunpack.c.l.b16 %v2066_v36 }
 0x349   : > { %v2038_v1 = vadd.f32 %v2037_v50, %v2004_v62  ;;  %v1985_v11 = vmul.f32 %v3851_v58, %v1973_v37  ;;  %v2036_v22 = vadd.f32 %v2035_v19, %v2034_v3  ;;  %v2100_v62 = vunpack.c.l.b16 %v2064_v33 }
 0x34a   : > { %v2099_v37 = vunpack.c.l.b16 %v2063_v35 }
 0x34b   : > { %v2039_v18 = vrot.slane %v2038_v1, 2  ;;  %v1997_v48 = vadd.f32 %v3859_v4, %v1985_v11  ;;  %v2059_v63 = vmul.f32 0.125, %v2036_v22 }
 0x34c   : > { %v1866_v57 = vpop.f32.mrf.mxu2  ;;  %v2108_v53 = vsel %vm2107_vm2, %v2100_v62, %v2099_v37 }
 0x34d   : > { %v2005_v60 = vmax.f32 %v1997_v48, 0.0  ;;  %v1867_v61 = vadd.f32 %v1866_v57, %v1789_v26  ;;  %v2040_v6 = vadd.f32 %v2039_v18, %v2038_v1  ;;  %v2067_v45 = vpack.c.bf16 %v2059_v63, %v2059_v63 }
 0x34f   : > { %v2043_v9 = vrot.slane %v2005_v60, 4  ;;  %v1974_v15 = vadd.f32 %v1964_v0, %v1867_v61  ;;  %v2041_v8 = vrot.slane %v2040_v6, 1  ;;  %v2103_v52 = vunpack.c.l.b16 %v2067_v45  ;;  %v2822_v61 = vld [vmem:[%s4057_s23] ss:$0 sm:$0xff] }
 0x351   : > { %v2044_v20 = vadd.f32 %v2043_v9, %v2005_v60  ;;  %v1986_v24 = vmul.f32 %v3851_v58, %v1974_v15  ;;  %v2042_v41 = vadd.f32 %v2041_v8, %v2040_v6 }
 0x353   : > { %v2045_v32 = vrot.slane %v2044_v20, 2  ;;  %v1998_v54 = vadd.f32 %v3859_v4, %v1986_v24  ;;  %v2060_v16 = vmul.f32 0.125, %v2042_v41  ;;  %v2065_v4 = vpack.c.bf16 %v2057_v5, %v2057_v5 }
 0x355   : > { %v2046_v21 = vadd.f32 %v2045_v32, %v2044_v20  ;;  %v2006_v29 = vmax.f32 %v1998_v54, 0.0  ;;  %v2068_v31 = vpack.c.bf16 %v2060_v16, %v2060_v16  ;;  %v2101_v44 = vunpack.c.l.b16 %v2065_v4 }
 0x357   : > { %v2047_v42 = vrot.slane %v2046_v21, 1  ;;  %v2049_v55 = vrot.slane %v2006_v29, 4  ;;  %v2104_v1 = vunpack.c.l.b16 %v2068_v31  ;;  %v2110_v49 = vsel %vm2109_vm15, %v2101_v44, %v2108_v53 }
 0x358   : > { %v2112_v18 = vsel %vm2111_vm9, %v2102_v2, %v2110_v49 }
 0x359   : > { %v2048_v58 = vadd.f32 %v2047_v42, %v2046_v21  ;;  %v2050_v47 = vadd.f32 %v2049_v55, %v2006_v29  ;;  %v2114_v26 = vsel %vm2113_vm10, %v2103_v52, %v2112_v18 }
 0x35a   : > { %v2116_v57 = vsel %vm2115_vm1, %v2104_v1, %v2114_v26 }
 0x35b   : > { %v2051_v17 = vrot.slane %v2050_v47, 2  ;;  %v2061_v34 = vmul.f32 0.125, %v2048_v58 }
 0x35d   : > { %v2052_v40 = vadd.f32 %v2051_v17, %v2050_v47  ;;  %v2069_v50 = vpack.c.bf16 %v2061_v34, %v2061_v34 }
 0x35f   : > { %v2053_v38 = vrot.slane %v2052_v40, 1  ;;  %v2105_v10 = vunpack.c.l.b16 %v2069_v50 }
 0x361   : > { %v2054_v43 = vadd.f32 %v2053_v38, %v2052_v40  ;;  %v2118_v59 = vsel %vm2117_vm11, %v2105_v10, %v2116_v57 }
 0x363   : > { %v2062_v11 = vmul.f32 0.125, %v2054_v43 }
 0x365   : > { %v2070_v48 = vpack.c.bf16 %v2062_v11, %v2062_v11 }
 0x367   : > { %v2106_v56 = vunpack.c.l.b16 %v2070_v48 }
 0x369   : > { %v2120_v13 = vsel %vm2119_vm5, %v2106_v56, %v2118_v59 }
 0x36a   : > { %v2121_v60 = vpack.c.b16 %v2120_v13, %v2120_v13 }
 0x36c   : > { %2179 = vmatmul.bf16.vlgmr.msrb.gmra.mxu0 %v2121_v60 }
 0x3e9   : > { %v2180_v0 = vpop.f32.mrf.mxu0 }
 0x3ea   : > { %v2181_v3 = vadd.f32 %v2822_v61, %v2180_v0 }
 0x3ec   : > { %2184 = vst [vmem:[%s538_s16] sm:$0xff] %v2181_v3 }
 0x3ed   : > { %2940 = shalt.err (!%p2937_p8)
}
 0x3ee   : > { %2754 = dma.vmem_to_hbm [thread:$0]  (%p3108_p5), %s2199_s17, 128, %s2201_s25, %s2186_s26  }
 0x3f1   : > { %v2182_v7 = vpop.f32.mrf.mxu0 }
 0x3f2 PF: > { %s4058_s20 = sld [smem:[#allocation14_spill]] }
 0x3f3   : > { %s4059_s27 = sld [smem:[#allocation12_spill]] }
 0x3f8   : > { %p2776_p9 = scmp.ge.s32.totalorder %s4058_s20, 2 }
 0x3f9   : > { %s2212_s30 = sand.u32 1, %s4059_s27  }
 0x3fa   : > { %p2767_p10 = pnand %p2776_p9, %p3112_p6  ;;  %s2213_s23 = scalar_lea.sflag [#allocation4], %s2212_s30 }
 0x3fc   : > { %p2768_p11 = pneg %p2767_p10 }
 0x3fe   : > { %2966 = dma.done.wait (%p2768_p11), %s2213_s23, 128  }
 0x3ff   : > { %2968 = vsyncadd (%p2768_p11), %s2213_s23, 4294967168  ;;  %s4061_s21 = sld [smem:[#allocation15_spill]]  ;;  %s4064_s18 = smov %s2975_s19 }
 0x400   : > { %s4062_s16 = sld [smem:[#allocation13_spill]] }
 0x401   : > { %s4063_s20 = sld [smem:[#allocation16_spill]] }
 0x405   : > { %p27_p12 = scmp.ge.s32.totalorder %s4061_s21, 6  }
 0x406   : > { %s4065_s19 = smov %s4062_s16 }
 0x407   :  { %29 = sbr.rel (!%p27_p12) target bundleno = 9 (0x9), region = 136 }
 0x40c   :  { %2219 = vsyncpa [#allocation3], 1 }
 0x40d   :  { %2221 = vsyncpa [#allocation3 + $0x1], 1 }
 0x40e   :  { %2222 = vsyncpa [#allocation6], 1 }
 0x40f   :  { %2223 = vsyncpa [#allocation4], 1 }
 0x410   :  { %2225 = vsyncpa [#allocation4 + $0x1], 1 }

</bundles_post_ra>
